<compile_context>
chip_gen: v5e
topology: v5e:2x2
jax: 0.10.0
libtpu: 0.0.40
codegen_flags: <defaults>
</compile_context>

<pallas_src>
import functools

import jax
import jax.numpy as jnp
from jax.experimental import pallas as pl
from jax.experimental.pallas import tpu as pltpu

PAD = 128          # lane width; every feature dim (18/64/32/16/9) fits in 128
N_LAYERS = 6
TB = 256           # batch tile rows per grid step (>=256 fills v6e/v7x MXU rows)


def deepnet_kernel(x_ref, w_ref, b_ref, o_ref):
    # x_ref: (TB, 128)       f32 padded activations (real features in lanes 0..17)
    # w_ref: (6, 128, 128)   bf16 padded weights, layer i laid out (in, out)
    # b_ref: (8, 128)        f32 padded biases, row i = bias of layer i (rows 6,7 unused)
    # o_ref: (TB, 128)       f32 padded logits (real values in lanes 0..n_actions-1)
    h = x_ref[...]                                               # (TB, 128) f32
    for i in range(N_LAYERS):                                    # static unroll
        w = w_ref[i]                                             # (128, 128) bf16
        b = b_ref[i:i + 1, :]                                    # (1, 128)   f32
        # bf16 MXU matmul with f32 accumulation; bias add / ReLU stay f32.
        h = jnp.dot(h.astype(jnp.bfloat16), w,
                    preferred_element_type=jnp.float32) + b
        if i < N_LAYERS - 1:
            h = jnp.maximum(h, 0.0)
    o_ref[...] = h


def pack_params(params):
    """Pack per-layer (W_t (in,out), b (1,out)) into two padded slabs.

    Weights are stored bf16 (half the DMA bytes, single-pass MXU); biases f32.
    """
    w_slab = jnp.zeros((N_LAYERS, PAD, PAD), jnp.bfloat16)
    b_slab = jnp.zeros((8, PAD), jnp.float32)        # 8 rows = sublane-aligned
    for i, (w_t, b) in enumerate(params):
        fin, fout = w_t.shape
        w_slab = w_slab.at[i, :fin, :fout].set(w_t.astype(jnp.bfloat16))
        b_slab = b_slab.at[i, :fout].set(b.reshape(-1).astype(jnp.float32))
    return w_slab, b_slab


@functools.partial(jax.jit, static_argnames=("n_actions",))
def deepnet_forward_batched(xb, w_slab, b_slab, n_actions=9):
    """Batched evaluation path.  xb: (B, H, W, C) -> (B, n_actions)."""
    B = xb.shape[0]
    x_flat = xb.reshape(B, -1).astype(jnp.float32)               # per-sample flatten
    n_feat = x_flat.shape[1]

    n_tiles = pl.cdiv(B, TB)
    b_pad = n_tiles * TB
    x_pad = jnp.zeros((b_pad, PAD), jnp.float32).at[:B, :n_feat].set(x_flat)

    out = pl.pallas_call(
        deepnet_kernel,
        out_shape=jax.ShapeDtypeStruct((b_pad, PAD), jnp.float32),
        grid=(n_tiles,),
        in_specs=[
            pl.BlockSpec((TB, PAD), lambda i: (i, 0)),              # activations
            # Constant index_map: weights / biases DMA'd once, stay VMEM-resident
            # across all batch tiles.
            pl.BlockSpec((N_LAYERS, PAD, PAD), lambda i: (0, 0, 0)),
            pl.BlockSpec((8, PAD), lambda i: (0, 0)),
        ],
        out_specs=pl.BlockSpec((TB, PAD), lambda i: (i, 0)),
        compiler_params=pltpu.CompilerParams(
            dimension_semantics=("parallel",)),     # megacore / both v7x TCs
    )(x_pad, w_slab, b_slab)
    return out[:B, :n_actions]


@functools.partial(jax.jit, static_argnames=("n_actions",))
def deepnet_forward(x, w_slab, b_slab, n_actions=9):
    """Single-sample forward matching the PyTorch module: (H,W,C) -> (n_actions,)."""
    return deepnet_forward_batched(x[None], w_slab, b_slab, n_actions=n_actions)[0]


def init_params(key, input_shape=(3, 3, 2), n_actions=9):
    """Deterministic init mimicking nn.Linear default (uniform +-1/sqrt(fan_in)).

    fc1's fan_in follows the PyTorch module literally:
    2 * input_shape[0] * input_shape[1] when len(input_shape) > 1; for the
    default (3, 3, 2) this equals the flattened size (18), matching forward().
    """
    if len(input_shape) == 1:
        in0 = input_shape[0]
    else:
        in0 = 2 * input_shape[0] * input_shape[1]                # 2*3*3 = 18
    dims = [in0, 64, 32, 32, 16, 16, n_actions]
    params = []
    for i in range(N_LAYERS):
        fan_in, fan_out = dims[i], dims[i + 1]
        key, kw, kb = jax.random.split(key, 3)
        bound = 1.0 / jnp.sqrt(jnp.float32(fan_in))
        # PyTorch stores weight as (out, in); build (out, in) then transpose.
        w = jax.random.uniform(kw, (fan_out, fan_in), jnp.float32, -bound, bound)
        b = jax.random.uniform(kb, (1, fan_out), jnp.float32, -bound, bound)
        params.append((w.T, b))
    return params


def reference_forward_f32(x_flat, params):
    """Full-precision f32 reference (original module numerics)."""
    h = x_flat.astype(jnp.float32)
    for i, (w_t, b) in enumerate(params):
        h = jnp.dot(h, w_t, precision=jax.lax.Precision.HIGHEST) + b[0]
        if i < N_LAYERS - 1:
            h = jnp.maximum(h, 0.0)
    return h


def reference_forward_bf16(x_flat, params):
    """Reference matching the kernel numerics (bf16 MXU inputs, f32 accumulate)."""
    h = x_flat.astype(jnp.float32)
    for i, (w_t, b) in enumerate(params):
        h = jnp.dot(h.astype(jnp.bfloat16), w_t.astype(jnp.bfloat16),
                    preferred_element_type=jnp.float32) + b[0]
        if i < N_LAYERS - 1:
            h = jnp.maximum(h, 0.0)
    return h


if __name__ == "__main__":
    key = jax.random.PRNGKey(0)
    kx, kxb, kp = jax.random.split(key, 3)

    params = init_params(kp, input_shape=(3, 3, 2), n_actions=9)
    w_slab, b_slab = pack_params(params)          # packed once, off the hot path

    # 1) Single-sample forward: exact PyTorch module semantics.
    x = jax.random.normal(kx, (3, 3, 2), dtype=jnp.float32)
    out = jax.block_until_ready(deepnet_forward(x, w_slab, b_slab, n_actions=9))
    assert out.shape == (9,)
    ref_bf16 = reference_forward_bf16(x.reshape(1, -1), params)[0]
    ref_f32 = reference_forward_f32(x.reshape(1, -1), params)[0]
    assert jnp.allclose(out, ref_bf16, atol=1e-3, rtol=1e-3), (out, ref_bf16)
    assert jnp.allclose(out, ref_f32, atol=5e-2, rtol=5e-2), (out, ref_f32)

    # 2) Small batched evaluation path (the throughput path from the review).
    xb = jax.random.normal(kxb, (4, 3, 3, 2), dtype=jnp.float32)
    outb = jax.block_until_ready(
        deepnet_forward_batched(xb, w_slab, b_slab, n_actions=9))
    assert outb.shape == (4, 9)
    refb = reference_forward_bf16(xb.reshape(4, -1), params)
    assert jnp.allclose(outb, refb, atol=1e-3, rtol=1e-3), (outb, refb)

    print("KERNEL_OK")
</pallas_src>

<mosaic_0001>
module attributes {stable_mosaic.version = 11 : i64} {
  func.func @deepnet_kernel(%arg0: i32, %arg1: memref<256x128xf32, #tpu.memory_space<vmem>>, %arg2: memref<6x128x128xbf16, #tpu.memory_space<vmem>>, %arg3: memref<8x128xf32, #tpu.memory_space<vmem>>, %arg4: memref<256x128xf32, #tpu.memory_space<vmem>>) attributes {dimension_semantics = [#tpu.dimension_semantics<parallel>], iteration_bounds = array<i64: 1>, scalar_prefetch = 0 : i64, scratch_operands = 0 : i64, tpu.core_type = #tpu.core_type<tc>, window_params = [{transform_indices = @transform_0, window_bounds = array<i64: 256, 128>}, {pipeline_mode = #tpu.pipeline_mode<synchronous>, transform_indices = @transform_1, window_bounds = array<i64: 6, 128, 128>}, {pipeline_mode = #tpu.pipeline_mode<synchronous>, transform_indices = @transform_2, window_bounds = array<i64: 8, 128>}, {transform_indices = @transform_3, window_bounds = array<i64: 256, 128>}]} {
    %c0 = arith.constant 0 : index
    %c0_0 = arith.constant 0 : index
    %0 = vector.load %arg1[%c0, %c0_0] : memref<256x128xf32, #tpu.memory_space<vmem>>, vector<256x128xf32>
    %c0_1 = arith.constant 0 : index
    %c0_2 = arith.constant 0 : index
    %c0_3 = arith.constant 0 : index
    %1 = vector.load %arg2[%c0_1, %c0_2, %c0_3] : memref<6x128x128xbf16, #tpu.memory_space<vmem>>, vector<1x128x128xbf16>
    %2 = vector.shape_cast %1 : vector<1x128x128xbf16> to vector<128x128xbf16>
    %c0_4 = arith.constant 0 : index
    %c0_5 = arith.constant 0 : index
    %3 = vector.load %arg3[%c0_4, %c0_5] : memref<8x128xf32, #tpu.memory_space<vmem>>, vector<1x128xf32>
    %4 = arith.truncf %0 : vector<256x128xf32> to vector<256x128xbf16>
    %cst = arith.constant dense<0.000000e+00> : vector<256x128xf32>
    %5 = tpu.matmul %4, %2, %cst {dimension_numbers = #tpu.dot_dimension_numbers<[1], [0], [0], [1], [0, 0, 1, 1], [], []>} : vector<256x128xbf16>, vector<128x128xbf16>, vector<256x128xf32> -> vector<256x128xf32>
    %6 = vector.broadcast %3 : vector<1x128xf32> to vector<256x128xf32>
    %7 = arith.addf %5, %6 : vector<256x128xf32>
    %cst_6 = arith.constant 0.000000e+00 : f32
    %8 = vector.broadcast %cst_6 : f32 to vector<256x128xf32>
    %9 = arith.maximumf %7, %8 : vector<256x128xf32>
    %c1 = arith.constant 1 : index
    %c0_7 = arith.constant 0 : index
    %c0_8 = arith.constant 0 : index
    %10 = vector.load %arg2[%c1, %c0_7, %c0_8] : memref<6x128x128xbf16, #tpu.memory_space<vmem>>, vector<1x128x128xbf16>
    %11 = vector.shape_cast %10 : vector<1x128x128xbf16> to vector<128x128xbf16>
    %c1_9 = arith.constant 1 : index
    %c0_10 = arith.constant 0 : index
    %12 = vector.load %arg3[%c1_9, %c0_10] : memref<8x128xf32, #tpu.memory_space<vmem>>, vector<1x128xf32>
    %13 = arith.truncf %9 : vector<256x128xf32> to vector<256x128xbf16>
    %cst_11 = arith.constant dense<0.000000e+00> : vector<256x128xf32>
    %14 = tpu.matmul %13, %11, %cst_11 {dimension_numbers = #tpu.dot_dimension_numbers<[1], [0], [0], [1], [0, 0, 1, 1], [], []>} : vector<256x128xbf16>, vector<128x128xbf16>, vector<256x128xf32> -> vector<256x128xf32>
    %15 = vector.broadcast %12 : vector<1x128xf32> to vector<256x128xf32>
    %16 = arith.addf %14, %15 : vector<256x128xf32>
    %cst_12 = arith.constant 0.000000e+00 : f32
    %17 = vector.broadcast %cst_12 : f32 to vector<256x128xf32>
    %18 = arith.maximumf %16, %17 : vector<256x128xf32>
    %c2 = arith.constant 2 : index
    %c0_13 = arith.constant 0 : index
    %c0_14 = arith.constant 0 : index
    %19 = vector.load %arg2[%c2, %c0_13, %c0_14] : memref<6x128x128xbf16, #tpu.memory_space<vmem>>, vector<1x128x128xbf16>
    %20 = vector.shape_cast %19 : vector<1x128x128xbf16> to vector<128x128xbf16>
    %c2_15 = arith.constant 2 : index
    %c0_16 = arith.constant 0 : index
    %21 = vector.load %arg3[%c2_15, %c0_16] : memref<8x128xf32, #tpu.memory_space<vmem>>, vector<1x128xf32>
    %22 = arith.truncf %18 : vector<256x128xf32> to vector<256x128xbf16>
    %cst_17 = arith.constant dense<0.000000e+00> : vector<256x128xf32>
    %23 = tpu.matmul %22, %20, %cst_17 {dimension_numbers = #tpu.dot_dimension_numbers<[1], [0], [0], [1], [0, 0, 1, 1], [], []>} : vector<256x128xbf16>, vector<128x128xbf16>, vector<256x128xf32> -> vector<256x128xf32>
    %24 = vector.broadcast %21 : vector<1x128xf32> to vector<256x128xf32>
    %25 = arith.addf %23, %24 : vector<256x128xf32>
    %cst_18 = arith.constant 0.000000e+00 : f32
    %26 = vector.broadcast %cst_18 : f32 to vector<256x128xf32>
    %27 = arith.maximumf %25, %26 : vector<256x128xf32>
    %c3 = arith.constant 3 : index
    %c0_19 = arith.constant 0 : index
    %c0_20 = arith.constant 0 : index
    %28 = vector.load %arg2[%c3, %c0_19, %c0_20] : memref<6x128x128xbf16, #tpu.memory_space<vmem>>, vector<1x128x128xbf16>
    %29 = vector.shape_cast %28 : vector<1x128x128xbf16> to vector<128x128xbf16>
    %c3_21 = arith.constant 3 : index
    %c0_22 = arith.constant 0 : index
    %30 = vector.load %arg3[%c3_21, %c0_22] : memref<8x128xf32, #tpu.memory_space<vmem>>, vector<1x128xf32>
    %31 = arith.truncf %27 : vector<256x128xf32> to vector<256x128xbf16>
    %cst_23 = arith.constant dense<0.000000e+00> : vector<256x128xf32>
    %32 = tpu.matmul %31, %29, %cst_23 {dimension_numbers = #tpu.dot_dimension_numbers<[1], [0], [0], [1], [0, 0, 1, 1], [], []>} : vector<256x128xbf16>, vector<128x128xbf16>, vector<256x128xf32> -> vector<256x128xf32>
    %33 = vector.broadcast %30 : vector<1x128xf32> to vector<256x128xf32>
    %34 = arith.addf %32, %33 : vector<256x128xf32>
    %cst_24 = arith.constant 0.000000e+00 : f32
    %35 = vector.broadcast %cst_24 : f32 to vector<256x128xf32>
    %36 = arith.maximumf %34, %35 : vector<256x128xf32>
    %c4 = arith.constant 4 : index
    %c0_25 = arith.constant 0 : index
    %c0_26 = arith.constant 0 : index
    %37 = vector.load %arg2[%c4, %c0_25, %c0_26] : memref<6x128x128xbf16, #tpu.memory_space<vmem>>, vector<1x128x128xbf16>
    %38 = vector.shape_cast %37 : vector<1x128x128xbf16> to vector<128x128xbf16>
    %c4_27 = arith.constant 4 : index
    %c0_28 = arith.constant 0 : index
    %39 = vector.load %arg3[%c4_27, %c0_28] : memref<8x128xf32, #tpu.memory_space<vmem>>, vector<1x128xf32>
    %40 = arith.truncf %36 : vector<256x128xf32> to vector<256x128xbf16>
    %cst_29 = arith.constant dense<0.000000e+00> : vector<256x128xf32>
    %41 = tpu.matmul %40, %38, %cst_29 {dimension_numbers = #tpu.dot_dimension_numbers<[1], [0], [0], [1], [0, 0, 1, 1], [], []>} : vector<256x128xbf16>, vector<128x128xbf16>, vector<256x128xf32> -> vector<256x128xf32>
    %42 = vector.broadcast %39 : vector<1x128xf32> to vector<256x128xf32>
    %43 = arith.addf %41, %42 : vector<256x128xf32>
    %cst_30 = arith.constant 0.000000e+00 : f32
    %44 = vector.broadcast %cst_30 : f32 to vector<256x128xf32>
    %45 = arith.maximumf %43, %44 : vector<256x128xf32>
    %c5 = arith.constant 5 : index
    %c0_31 = arith.constant 0 : index
    %c0_32 = arith.constant 0 : index
    %46 = vector.load %arg2[%c5, %c0_31, %c0_32] : memref<6x128x128xbf16, #tpu.memory_space<vmem>>, vector<1x128x128xbf16>
    %47 = vector.shape_cast %46 : vector<1x128x128xbf16> to vector<128x128xbf16>
    %c5_33 = arith.constant 5 : index
    %c0_34 = arith.constant 0 : index
    %48 = vector.load %arg3[%c5_33, %c0_34] : memref<8x128xf32, #tpu.memory_space<vmem>>, vector<1x128xf32>
    %49 = arith.truncf %45 : vector<256x128xf32> to vector<256x128xbf16>
    %cst_35 = arith.constant dense<0.000000e+00> : vector<256x128xf32>
    %50 = tpu.matmul %49, %47, %cst_35 {dimension_numbers = #tpu.dot_dimension_numbers<[1], [0], [0], [1], [0, 0, 1, 1], [], []>} : vector<256x128xbf16>, vector<128x128xbf16>, vector<256x128xf32> -> vector<256x128xf32>
    %51 = vector.broadcast %48 : vector<1x128xf32> to vector<256x128xf32>
    %52 = arith.addf %50, %51 : vector<256x128xf32>
    %c0_36 = arith.constant 0 : index
    %c0_37 = arith.constant 0 : index
    %53 = vector.load %arg4[%c0_36, %c0_37] : memref<256x128xf32, #tpu.memory_space<vmem>>, vector<256x128xf32>
    tpu.vector_store %arg4[%c0_36, %c0_37], %52 {strides = array<i32>} : memref<256x128xf32, #tpu.memory_space<vmem>>, vector<256x128xf32>,
    return
  }
  func.func @transform_0(%arg0: i32) -> (i32, i32) {
    %c0_i32 = arith.constant 0 : i32
    %c0_i32_0 = arith.constant 0 : i32
    return %arg0, %c0_i32 : i32, i32
  }
  func.func @transform_1(%arg0: i32) -> (i32, i32, i32) {
    %c0_i32 = arith.constant 0 : i32
    %c0_i32_0 = arith.constant 0 : i32
    %c0_i32_1 = arith.constant 0 : i32
    %c0_i32_2 = arith.constant 0 : i32
    return %c0_i32, %c0_i32_0, %c0_i32_1 : i32, i32, i32
  }
  func.func @transform_2(%arg0: i32) -> (i32, i32) {
    %c0_i32 = arith.constant 0 : i32
    %c0_i32_0 = arith.constant 0 : i32
    %c0_i32_1 = arith.constant 0 : i32
    return %c0_i32, %c0_i32_0 : i32, i32
  }
  func.func @transform_3(%arg0: i32) -> (i32, i32) {
    %c0_i32 = arith.constant 0 : i32
    %c0_i32_0 = arith.constant 0 : i32
    return %arg0, %c0_i32 : i32, i32
  }
}

</mosaic_0001>

<bundles_post_ra>
// kernel: deepnet_forward_batched.1
= control target key start
LH: loop header
LB: loop body
LE: loop exit
PB: predicated region body
PF: predicated region fallthrough
CT: control target
= control target key end

     0   :  { %8 = vsyncpa [#allocation3], 0  ;;  %s1581_s15 = smov [#allocation2]   ;;  %s1582_s17 = smov 64   ;;  %s2021_s0 = inlined_call_operand.vmem [shape: f32[256,128], index: 0, kind: input, shape index: {}]   ;;  %s2022_s1 = inlined_call_operand.hbm [shape: bf16[6,128,128], index: 1, kind: input, shape index: {}]   ;;  %s2023_s2 = inlined_call_operand.vmem [shape: f32[8,128], index: 2, kind: input, shape index: {}]   ;;  %s2024_s3 = inlined_call_operand.vmem [shape: f32[256,128], index: 3, kind: output, shape index: {}]  }
   0x1   :  { %s15_s14 = sshll.u32 %s2022_s1, 4  ;;  %s17_s16 = sshll.u32 %s1581_s15, 4  ;;  %s16_s14 = int_to_ptr.hbm [resolvable:$true] %s15_s14  ;;  %s18_s16 = int_to_ptr.vmem [resolvable:$true] %s17_s16 }
   0x2   :  { %s1583_s18 = smov 4  }
   0x3   :  { %23 = dma.hbm_to_vmem [thread:$0]  %s16_s14, 6144, %s18_s16, [#allocation3], %s1582_s17, %s1582_s17, %s1583_s18  }
   0x4   :  { %1579 = dma.done.wait [#allocation3], 6144  }
   0x5   :  { %1580 = vsyncadd [#allocation3], 4294961152  ;;  %v1489_v0 = vld [vmem:[#allocation2 + $0x38] sm:$0xff]  ;;  %v1488_v1 = vld [vmem:[#allocation2 + $0x30] sm:$0xff] }
   0x6   :  { %144 = vmatpush.bf16.msra.mxu0 %v1489_v0  ;;  %1530 = vmatpush.bf16.msra.mxu2 %v1489_v0  ;;  %v1487_v2 = vld [vmem:[#allocation2 + $0x28] sm:$0xff]  ;;  %v1486_v3 = vld [vmem:[#allocation2 + $0x20] sm:$0xff]  ;;  %v1485_v4 = vld [vmem:[#allocation2 + $0x18] sm:$0xff] }
   0x7   :  { %v1484_v5 = vld [vmem:[#allocation2 + $0x10] sm:$0xff]  ;;  %v1483_v6 = vld [vmem:[#allocation2 + $0x8] sm:$0xff]  ;;  %v1482_v7 = vld [vmem:[#allocation2] sm:$0xff] }
   0x8   :  { %v30_v8 = vld [vmem:[%s2021_s0] sm:$0xff]  ;;  %v31_v9 = vld [vmem:[%s2021_s0 + $0x8] sm:$0xff]  ;;  %v32_v11 = vld [vmem:[%s2021_s0 + $0x10] sm:$0xff] }
   0x9   :  { %v79_v10 = vpack.c.bf16 %v31_v9, %v30_v8  ;;  %v33_v12 = vld [vmem:[%s2021_s0 + $0x18] sm:$0xff]  ;;  %v34_v14 = vld [vmem:[%s2021_s0 + $0x20] sm:$0xff]  ;;  %v35_v15 = vld [vmem:[%s2021_s0 + $0x28] sm:$0xff] }
   0xa   :  { %145 = vmatpush.bf16.msra.mxu0 %v1488_v1  ;;  %1531 = vmatpush.bf16.msra.mxu2 %v1488_v1  ;;  %v80_v13 = vpack.c.bf16 %v33_v12, %v32_v11  ;;  %v81_v16 = vpack.c.bf16 %v35_v15, %v34_v14  ;;  %v36_v17 = vld [vmem:[%s2021_s0 + $0x30] sm:$0xff]  ;;  %v37_v18 = vld [vmem:[%s2021_s0 + $0x38] sm:$0xff]  ;;  %v38_v20 = vld [vmem:[%s2021_s0 + $0x40] sm:$0xff] }
   0xb   :  { %v82_v19 = vpack.c.bf16 %v37_v18, %v36_v17  ;;  %v39_v21 = vld [vmem:[%s2021_s0 + $0x48] sm:$0xff]  ;;  %v46_v23 = vld [vmem:[%s2021_s0 + $0x80] sm:$0xff]  ;;  %v1497_v25 = vld [vmem:[#allocation2 + $0x78] sm:$0xff] }
   0xc   :  { %v83_v22 = vpack.c.bf16 %v39_v21, %v38_v20  ;;  %v47_v24 = vld [vmem:[%s2021_s0 + $0x88] sm:$0xff]  ;;  %348 = vmatpush.bf16.msra.mxu1 %v1497_v25  ;;  %1538 = vmatpush.bf16.msra.mxu3 %v1497_v25  ;;  %v40_v27 = vld [vmem:[%s2021_s0 + $0x50] sm:$0xff]  ;;  %v41_v28 = vld [vmem:[%s2021_s0 + $0x58] sm:$0xff] }
   0xd   :  { %v87_v26 = vpack.c.bf16 %v47_v24, %v46_v23  ;;  %v84_v29 = vpack.c.bf16 %v41_v28, %v40_v27  ;;  %v1496_v30 = vld [vmem:[#allocation2 + $0x70] sm:$0xff]  ;;  %v49_v32 = vld [vmem:[%s2021_s0 + $0x98] sm:$0xff]  ;;  %v1495_v34 = vld [vmem:[#allocation2 + $0x68] sm:$0xff] }
   0xe   :  { %146 = vmatpush.bf16.msra.mxu0 %v1487_v2  ;;  %1532 = vmatpush.bf16.msra.mxu2 %v1487_v2  ;;  %v48_v31 = vld [vmem:[%s2021_s0 + $0x90] sm:$0xff]  ;;  %v1494_v35 = vld [vmem:[#allocation2 + $0x60] sm:$0xff]  ;;  %v43_v37 = vld [vmem:[%s2021_s0 + $0x68] sm:$0xff] }
   0xf   :  { %v88_v33 = vpack.c.bf16 %v49_v32, %v48_v31  ;;  %v42_v36 = vld [vmem:[%s2021_s0 + $0x60] sm:$0xff]  ;;  %v1493_v38 = vld [vmem:[#allocation2 + $0x58] sm:$0xff]  ;;  %v1492_v40 = vld [vmem:[#allocation2 + $0x50] sm:$0xff] }
  0x10   :  { %349 = vmatpush.bf16.msra.mxu1 %v1496_v30  ;;  %1539 = vmatpush.bf16.msra.mxu3 %v1496_v30  ;;  %v85_v39 = vpack.c.bf16 %v43_v37, %v42_v36  ;;  %v50_v41 = vld [vmem:[%s2021_s0 + $0xa0] sm:$0xff]  ;;  %v51_v42 = vld [vmem:[%s2021_s0 + $0xa8] sm:$0xff]  ;;  %v44_v46 = vld [vmem:[%s2021_s0 + $0x70] sm:$0xff] }
  0x11   :  { %v89_v43 = vpack.c.bf16 %v51_v42, %v50_v41  ;;  %v1491_v44 = vld [vmem:[#allocation2 + $0x48] sm:$0xff]  ;;  %v1490_v45 = vld [vmem:[#allocation2 + $0x40] sm:$0xff]  ;;  %v45_v47 = vld [vmem:[%s2021_s0 + $0x78] sm:$0xff] }
  0x12   :  { %147 = vmatpush.bf16.msra.mxu0 %v1486_v3  ;;  %1533 = vmatpush.bf16.msra.mxu2 %v1486_v3  ;;  %v86_v48 = vpack.c.bf16 %v45_v47, %v44_v46  ;;  %v52_v49 = vld [vmem:[%s2021_s0 + $0xb0] sm:$0xff]  ;;  %v53_v50 = vld [vmem:[%s2021_s0 + $0xb8] sm:$0xff]  ;;  %v1682_v54 = vld [vmem:[%s2023_s2] ss:$0 sm:$0xff] }
  0x13   :  { %v90_v51 = vpack.c.bf16 %v53_v50, %v52_v49  ;;  %v1505_v52 = vld [vmem:[#allocation2 + $0xb8] sm:$0xff]  ;;  %v54_v55 = vld [vmem:[%s2021_s0 + $0xc0] sm:$0xff]  ;;  %v55_v56 = vld [vmem:[%s2021_s0 + $0xc8] sm:$0xff] }
  0x14   :  { %350 = vmatpush.bf16.msra.mxu1 %v1495_v34  ;;  %1540 = vmatpush.bf16.msra.mxu3 %v1495_v34  ;;  %v91_v57 = vpack.c.bf16 %v55_v56, %v54_v55  ;;  %v1504_v63 = vld [vmem:[#allocation2 + $0xb0] sm:$0xff]  ;;  %v57_v3 = vld [vmem:[%s2021_s0 + $0xd8] sm:$0xff]  ;;  %v59_v14 = vld [vmem:[%s2021_s0 + $0xe8] sm:$0xff] }
  0x15   :  { %v56_v2 = vld [vmem:[%s2021_s0 + $0xd0] sm:$0xff]  ;;  %v1502_v21 = vld [vmem:[#allocation2 + $0xa0] sm:$0xff]  ;;  %v61_v25 = vld [vmem:[%s2021_s0 + $0xf8] sm:$0xff] }
  0x16   :  { %148 = vmatpush.bf16.msra.mxu0 %v1485_v4  ;;  %1534 = vmatpush.bf16.msra.mxu2 %v1485_v4  ;;  %v92_v4 = vpack.c.bf16 %v57_v3, %v56_v2  ;;  %v60_v24 = vld [vmem:[%s2021_s0 + $0xf0] sm:$0xff]  ;;  %v1501_v32 = vld [vmem:[#allocation2 + $0x98] sm:$0xff] }
  0x17   :  { %v1500_v41 = vld [vmem:[#allocation2 + $0x90] sm:$0xff] }
  0x18   :  { %351 = vmatpush.bf16.msra.mxu1 %v1494_v35  ;;  %1541 = vmatpush.bf16.msra.mxu3 %v1494_v35 }
  0x1a   :  { %149 = vmatpush.bf16.msra.mxu0 %v1484_v5  ;;  %1535 = vmatpush.bf16.msra.mxu2 %v1484_v5 }
  0x1c   :  { %352 = vmatpush.bf16.msra.mxu1 %v1493_v38  ;;  %1542 = vmatpush.bf16.msra.mxu3 %v1493_v38 }
  0x1e   :  { %150 = vmatpush.bf16.msra.mxu0 %v1483_v6  ;;  %1536 = vmatpush.bf16.msra.mxu2 %v1483_v6 }
  0x20   :  { %353 = vmatpush.bf16.msra.mxu1 %v1492_v40  ;;  %1543 = vmatpush.bf16.msra.mxu3 %v1492_v40 }
  0x22   :  { %151 = vmatpush.bf16.msra.mxu0 %v1482_v7  ;;  %1537 = vmatpush.bf16.msra.mxu2 %v1482_v7 }
  0x24   :  { %354 = vmatpush.bf16.msra.mxu1 %v1491_v44  ;;  %1544 = vmatpush.bf16.msra.mxu3 %v1491_v44 }
  0x25   :  { %152 = vmatmul.bf16.vlgmr.msra.gmra.mxu0 %v79_v10  ;;  %192 = vmatmul.bf16.vlgmr.msra.gmra.mxu2 %v87_v26  ;;  %v1503_v10 = vld [vmem:[#allocation2 + $0xa8] sm:$0xff]  ;;  %v94_v26 = vpack.c.bf16 %v61_v25, %v60_v24 }
  0x26   :  { %552 = vmatpush.bf16.msrb.mxu2 %v1505_v52 }
  0x28   :  { %355 = vmatpush.bf16.msra.mxu1 %v1490_v45  ;;  %1545 = vmatpush.bf16.msra.mxu3 %v1490_v45 }
  0x2a   :  { %553 = vmatpush.bf16.msrb.mxu2 %v1504_v63 }
  0x2e   :  { %554 = vmatpush.bf16.msrb.mxu2 %v1503_v10 }
  0x32   :  { %555 = vmatpush.bf16.msrb.mxu2 %v1502_v21 }
  0x35   :  { %157 = vmatmul.bf16.gmra.mxu0 %v80_v13  ;;  %197 = vmatmul.bf16.gmra.mxu2 %v88_v33  ;;  %v58_v13 = vld [vmem:[%s2021_s0 + $0xe0] sm:$0xff] }
  0x36   :  { %v93_v15 = vpack.c.bf16 %v59_v14, %v58_v13  ;;  %556 = vmatpush.bf16.msrb.mxu2 %v1501_v32  ;;  %v1735_v32 = vld [vmem:[%s2023_s2 + $0x1] ss:$0 sm:$0xff] }
  0x3a   :  { %557 = vmatpush.bf16.msrb.mxu2 %v1500_v41 }
  0x45   :  { %162 = vmatmul.bf16.gmra.mxu0 %v81_v16  ;;  %202 = vmatmul.bf16.gmra.mxu2 %v89_v43 }
  0x55   :  { %167 = vmatmul.bf16.gmra.mxu0 %v82_v19  ;;  %207 = vmatmul.bf16.gmra.mxu2 %v90_v51 }
  0x65   :  { %172 = vmatmul.bf16.gmra.mxu0 %v83_v22  ;;  %212 = vmatmul.bf16.gmra.mxu2 %v91_v57  ;;  %v1499_v57 = vld [vmem:[#allocation2 + $0x88] sm:$0xff] }
  0x66   :  { %558 = vmatpush.bf16.msrb.mxu2 %v1499_v57 }
  0x75   :  { %177 = vmatmul.bf16.gmra.mxu0 %v84_v29  ;;  %217 = vmatmul.bf16.gmra.mxu2 %v92_v4 }
  0x85   :  { %182 = vmatmul.bf16.gmra.mxu0 %v85_v39  ;;  %222 = vmatmul.bf16.gmra.mxu2 %v93_v15 }
  0x95   :  { %187 = vmatmul.bf16.gmra.mxu0 %v86_v48  ;;  %227 = vmatmul.bf16.gmra.mxu2 %v94_v26 }
  0xa2   :  { %v153_v53 = vpop.f32.mrf.mxu0 }
  0xa3   :  { %v154_v58 = vadd.f32 %v1682_v54, %v153_v53 }
  0xa5   :  { %v233_v61 = vmax.f32 %v154_v58, 0.0 }
  0xa8   :  { %v193_v38 = vpop.f32.mrf.mxu2 }
  0xa9   :  { %v194_v43 = vadd.f32 %v1682_v54, %v193_v38 }
  0xaa   :  { %v155_v59 = vpop.f32.mrf.mxu0 }
  0xab   :  { %v156_v60 = vadd.f32 %v1682_v54, %v155_v59  ;;  %v249_v46 = vmax.f32 %v194_v43, 0.0 }
  0xad   :  { %v234_v62 = vmax.f32 %v156_v60, 0.0  ;;  %v1498_v60 = vld [vmem:[#allocation2 + $0x80] sm:$0xff] }
  0xae   :  { %559 = vmatpush.bf16.msrb.mxu2 %v1498_v60 }
  0xaf   :  { %v283_v0 = vpack.c.bf16 %v234_v62, %v233_v61 }
  0xb0   :  { %v195_v45 = vpop.f32.mrf.mxu2 }
  0xb1   :  { %356 = vmatmul.bf16.vlgmr.msra.gmra.mxu1 %v283_v0  ;;  %v196_v47 = vadd.f32 %v1682_v54, %v195_v45 }
  0xb2   :  { %v158_v1 = vpop.f32.mrf.mxu0 }
  0xb3   :  { %v159_v5 = vadd.f32 %v1682_v54, %v158_v1  ;;  %v250_v48 = vmax.f32 %v196_v47, 0.0 }
  0xb5   :  { %v235_v8 = vmax.f32 %v159_v5, 0.0  ;;  %v291_v50 = vpack.c.bf16 %v250_v48, %v249_v46 }
  0xb7   :  { %396 = vmatmul.bf16.vlgmr.msra.gmra.mxu3 %v291_v50 }
  0xb8   :  { %v198_v53 = vpop.f32.mrf.mxu2 }
  0xb9   :  { %v199_v59 = vadd.f32 %v1682_v54, %v198_v53 }
  0xba   :  { %v160_v6 = vpop.f32.mrf.mxu0 }
  0xbb   :  { %v161_v7 = vadd.f32 %v1682_v54, %v160_v6  ;;  %v251_v63 = vmax.f32 %v199_v59, 0.0 }
  0xbd   :  { %v236_v9 = vmax.f32 %v161_v7, 0.0 }
  0xbf   :  { %v284_v11 = vpack.c.bf16 %v236_v9, %v235_v8 }
  0xc0   :  { %v200_v62 = vpop.f32.mrf.mxu2 }
  0xc1   :  { %361 = vmatmul.bf16.gmra.mxu1 %v284_v11  ;;  %v201_v0 = vadd.f32 %v1682_v54, %v200_v62 }
  0xc2   :  { %v163_v12 = vpop.f32.mrf.mxu0 }
  0xc3   :  { %v164_v16 = vadd.f32 %v1682_v54, %v163_v12  ;;  %v252_v1 = vmax.f32 %v201_v0, 0.0 }
  0xc5   :  { %v237_v19 = vmax.f32 %v164_v16, 0.0  ;;  %v292_v3 = vpack.c.bf16 %v252_v1, %v251_v63  ;;  %v1511_v1 = vld [vmem:[#allocation2 + $0xe8] sm:$0xff] }
  0xc7   :  { %401 = vmatmul.bf16.gmra.mxu3 %v292_v3 }
  0xc8   :  { %v203_v6 = vpop.f32.mrf.mxu2 }
  0xc9   :  { %v204_v10 = vadd.f32 %v1682_v54, %v203_v6 }
  0xca   :  { %v165_v17 = vpop.f32.mrf.mxu0 }
  0xcb   :  { %v166_v18 = vadd.f32 %v1682_v54, %v165_v17  ;;  %v253_v13 = vmax.f32 %v204_v10, 0.0 }
  0xcd   :  { %v238_v20 = vmax.f32 %v166_v18, 0.0 }
  0xcf   :  { %v285_v22 = vpack.c.bf16 %v238_v20, %v237_v19 }
  0xd0   :  { %v205_v12 = vpop.f32.mrf.mxu2 }
  0xd1   :  { %366 = vmatmul.bf16.gmra.mxu1 %v285_v22  ;;  %v206_v14 = vadd.f32 %v1682_v54, %v205_v12 }
  0xd2   :  { %v168_v23 = vpop.f32.mrf.mxu0 }
  0xd3   :  { %v169_v27 = vadd.f32 %v1682_v54, %v168_v23  ;;  %v254_v15 = vmax.f32 %v206_v14, 0.0 }
  0xd5   :  { %v239_v30 = vmax.f32 %v169_v27, 0.0  ;;  %v293_v17 = vpack.c.bf16 %v254_v15, %v253_v13 }
  0xd7   :  { %406 = vmatmul.bf16.gmra.mxu3 %v293_v17 }
  0xd8   :  { %v208_v20 = vpop.f32.mrf.mxu2 }
  0xd9   :  { %v209_v24 = vadd.f32 %v1682_v54, %v208_v20 }
  0xda   :  { %v170_v28 = vpop.f32.mrf.mxu0 }
  0xdb   :  { %v171_v29 = vadd.f32 %v1682_v54, %v170_v28  ;;  %v255_v26 = vmax.f32 %v209_v24, 0.0 }
  0xdd   :  { %v240_v31 = vmax.f32 %v171_v29, 0.0 }
  0xdf   :  { %v286_v33 = vpack.c.bf16 %v240_v31, %v239_v30 }
  0xe0   :  { %v210_v25 = vpop.f32.mrf.mxu2 }
  0xe1   :  { %371 = vmatmul.bf16.gmra.mxu1 %v286_v33  ;;  %v211_v27 = vadd.f32 %v1682_v54, %v210_v25 }
  0xe2   :  { %v173_v34 = vpop.f32.mrf.mxu0 }
  0xe3   :  { %v174_v35 = vadd.f32 %v1682_v54, %v173_v34  ;;  %v256_v28 = vmax.f32 %v211_v27, 0.0  ;;  %v1513_v34 = vld [vmem:[#allocation2 + $0xf8] sm:$0xff] }
  0xe4   :  { %756 = vmatpush.bf16.msrb.mxu3 %v1513_v34 }
  0xe5   :  { %v241_v39 = vmax.f32 %v174_v35, 0.0  ;;  %v294_v29 = vpack.c.bf16 %v256_v28, %v255_v26 }
  0xe7   :  { %411 = vmatmul.bf16.gmra.mxu3 %v294_v29  ;;  %v1509_v29 = vld [vmem:[#allocation2 + $0xd8] sm:$0xff] }
  0xe8   :  { %v213_v30 = vpop.f32.mrf.mxu2 }
  0xe9   :  { %v214_v33 = vadd.f32 %v1682_v54, %v213_v30 }
  0xea   :  { %v175_v36 = vpop.f32.mrf.mxu0 }
  0xeb   :  { %v176_v37 = vadd.f32 %v1682_v54, %v175_v36 }
  0xed   :  { %v242_v40 = vmax.f32 %v176_v37, 0.0  ;;  %v257_v37 = vmax.f32 %v214_v33, 0.0 }
  0xef   :  { %v287_v42 = vpack.c.bf16 %v242_v40, %v241_v39 }
  0xf0   :  { %v215_v35 = vpop.f32.mrf.mxu2 }
  0xf1   :  { %376 = vmatmul.bf16.gmra.mxu1 %v287_v42  ;;  %v216_v38 = vadd.f32 %v1682_v54, %v215_v35 }
  0xf2   :  { %v178_v44 = vpop.f32.mrf.mxu0 }
  0xf3   :  { %v179_v49 = vadd.f32 %v1682_v54, %v178_v44  ;;  %v258_v41 = vmax.f32 %v216_v38, 0.0 }
  0xf5   :  { %v243_v55 = vmax.f32 %v179_v49, 0.0  ;;  %v295_v44 = vpack.c.bf16 %v258_v41, %v257_v37  ;;  %v1512_v49 = vld [vmem:[#allocation2 + $0xf0] sm:$0xff] }
  0xf6   :  { %757 = vmatpush.bf16.msrb.mxu3 %v1512_v49  ;;  %v1508_v37 = vld [vmem:[#allocation2 + $0xd0] sm:$0xff] }
  0xf7   :  { %416 = vmatmul.bf16.gmra.mxu3 %v295_v44 }
  0xf8   :  { %v218_v46 = vpop.f32.mrf.mxu2 }
  0xf9   :  { %v219_v48 = vadd.f32 %v1682_v54, %v218_v46 }
  0xfa   :  { %v180_v51 = vpop.f32.mrf.mxu0  ;;  %758 = vmatpush.bf16.msrb.mxu3 %v1511_v1 }
  0xfb   :  { %v181_v52 = vadd.f32 %v1682_v54, %v180_v51 }
  0xfd   :  { %v244_v56 = vmax.f32 %v181_v52, 0.0  ;;  %v259_v52 = vmax.f32 %v219_v48, 0.0 }
  0xff   :  { %v288_v58 = vpack.c.bf16 %v244_v56, %v243_v55 }
 0x100   :  { %v220_v50 = vpop.f32.mrf.mxu2 }
 0x101   :  { %381 = vmatmul.bf16.gmra.mxu1 %v288_v58  ;;  %v221_v53 = vadd.f32 %v1682_v54, %v220_v50 }
 0x102   :  { %v183_v61 = vpop.f32.mrf.mxu0 }
 0x103   :  { %v184_v2 = vadd.f32 %v1682_v54, %v183_v61  ;;  %v260_v57 = vmax.f32 %v221_v53, 0.0 }
 0x105   :  { %v245_v7 = vmax.f32 %v184_v2, 0.0  ;;  %v296_v60 = vpack.c.bf16 %v260_v57, %v259_v52 }
 0x107   :  { %421 = vmatmul.bf16.gmra.mxu3 %v296_v60 }
 0x108   :  { %v223_v62 = vpop.f32.mrf.mxu2 }
 0x109   :  { %v224_v0 = vadd.f32 %v1682_v54, %v223_v62 }
 0x10a   :  { %v185_v4 = vpop.f32.mrf.mxu0 }
 0x10b   :  { %v186_v5 = vadd.f32 %v1682_v54, %v185_v4  ;;  %v261_v4 = vmax.f32 %v224_v0, 0.0 }
 0x10d   :  { %v246_v8 = vmax.f32 %v186_v5, 0.0 }
 0x10f   :  { %v289_v9 = vpack.c.bf16 %v246_v8, %v245_v7 }
 0x110   :  { %v225_v2 = vpop.f32.mrf.mxu2 }
 0x111   :  { %386 = vmatmul.bf16.gmra.mxu1 %v289_v9  ;;  %v226_v5 = vadd.f32 %v1682_v54, %v225_v2 }
 0x112   :  { %v188_v11 = vpop.f32.mrf.mxu0 }
 0x113   :  { %v189_v16 = vadd.f32 %v1682_v54, %v188_v11  ;;  %v262_v8 = vmax.f32 %v226_v5, 0.0 }
 0x115   :  { %v247_v21 = vmax.f32 %v189_v16, 0.0  ;;  %v297_v11 = vpack.c.bf16 %v262_v8, %v261_v4  ;;  %v1510_v16 = vld [vmem:[#allocation2 + $0xe0] sm:$0xff] }
 0x116   :  { %759 = vmatpush.bf16.msrb.mxu3 %v1510_v16 }
 0x117   :  { %426 = vmatmul.bf16.gmra.mxu3 %v297_v11  ;;  %v1768_v11 = vld [vmem:[%s2023_s2 + $0x2] ss:$0 sm:$0xff] }
 0x118   :  { %v228_v13 = vpop.f32.mrf.mxu2 }
 0x119   :  { %v229_v15 = vadd.f32 %v1682_v54, %v228_v13 }
 0x11a   :  { %v190_v18 = vpop.f32.mrf.mxu0  ;;  %760 = vmatpush.bf16.msrb.mxu3 %v1509_v29 }
 0x11b   :  { %v191_v19 = vadd.f32 %v1682_v54, %v190_v18 }
 0x11d   :  { %v248_v22 = vmax.f32 %v191_v19, 0.0  ;;  %v263_v19 = vmax.f32 %v229_v15, 0.0 }
 0x11e   :  { %761 = vmatpush.bf16.msrb.mxu3 %v1508_v37 }
 0x11f   :  { %v290_v23 = vpack.c.bf16 %v248_v22, %v247_v21 }
 0x120   :  { %v230_v17 = vpop.f32.mrf.mxu2 }
 0x121   :  { %391 = vmatmul.bf16.gmra.mxu1 %v290_v23  ;;  %v231_v20 = vadd.f32 %v1682_v54, %v230_v17 }
 0x123   :  { %v264_v23 = vmax.f32 %v231_v20, 0.0 }
 0x125   :  { %v298_v26 = vpack.c.bf16 %v264_v23, %v263_v19 }
 0x127   :  { %431 = vmatmul.bf16.gmra.mxu3 %v298_v26 }
 0x12e   :  { %v357_v31 = vpop.f32.mrf.mxu1 }
 0x12f   :  { %v358_v36 = vadd.f32 %v1735_v32, %v357_v31 }
 0x131   :  { %v437_v42 = vmax.f32 %v358_v36, 0.0 }
 0x136   :  { %v359_v39 = vpop.f32.mrf.mxu1 }
 0x137   :  { %v360_v40 = vadd.f32 %v1735_v32, %v359_v39 }
 0x139   :  { %v438_v43 = vmax.f32 %v360_v40, 0.0 }
 0x13b   :  { %v487_v45 = vpack.c.bf16 %v438_v43, %v437_v42  ;;  %v397_v43 = vpop.f32.mrf.mxu3 }
 0x13c   :  { %v398_v2 = vadd.f32 %v1735_v32, %v397_v43 }
 0x13d   :  { %560 = vmatmul.bf16.vlgmr.msrb.gmra.mxu2 %v487_v45  ;;  %v1507_v45 = vld [vmem:[#allocation2 + $0xc8] sm:$0xff] }
 0x13e   :  { %v362_v47 = vpop.f32.mrf.mxu1  ;;  %762 = vmatpush.bf16.msrb.mxu3 %v1507_v45  ;;  %v453_v4 = vmax.f32 %v398_v2, 0.0 }
 0x13f   :  { %v363_v51 = vadd.f32 %v1735_v32, %v362_v47 }
 0x141   :  { %v439_v58 = vmax.f32 %v363_v51, 0.0 }
 0x143   :  { %v399_v47 = vpop.f32.mrf.mxu3 }
 0x146   :  { %v364_v55 = vpop.f32.mrf.mxu1 }
 0x147   :  { %v365_v56 = vadd.f32 %v1735_v32, %v364_v55  ;;  %v1506_v55 = vld [vmem:[#allocation2 + $0xc0] sm:$0xff] }
 0x148   :  { %763 = vmatpush.bf16.msrb.mxu3 %v1506_v55 }
 0x149   :  { %v440_v59 = vmax.f32 %v365_v56, 0.0 }
 0x14b   :  { %v488_v61 = vpack.c.bf16 %v440_v59, %v439_v58  ;;  %v402_v57 = vpop.f32.mrf.mxu3 }
 0x14d   :  { %565 = vmatmul.bf16.gmra.mxu2 %v488_v61 }
 0x14e   :  { %v367_v63 = vpop.f32.mrf.mxu1 }
 0x14f   :  { %v368_v3 = vadd.f32 %v1735_v32, %v367_v63 }
 0x151   :  { %v441_v9 = vmax.f32 %v368_v3, 0.0  ;;  %v400_v3 = vadd.f32 %v1735_v32, %v399_v47 }
 0x153   :  { %v404_v61 = vpop.f32.mrf.mxu3  ;;  %v454_v5 = vmax.f32 %v400_v3, 0.0 }
 0x156   :  { %v369_v6 = vpop.f32.mrf.mxu1 }
 0x157   :  { %v370_v7 = vadd.f32 %v1735_v32, %v369_v6  ;;  %v495_v6 = vpack.c.bf16 %v454_v5, %v453_v4 }
 0x159   :  { %v442_v10 = vmax.f32 %v370_v7, 0.0 }
 0x15b   :  { %v489_v12 = vpack.c.bf16 %v442_v10, %v441_v9  ;;  %v407_v1 = vpop.f32.mrf.mxu3  ;;  %v403_v9 = vadd.f32 %v1735_v32, %v402_v57  ;;  %v405_v10 = vadd.f32 %v1735_v32, %v404_v61  ;;  %v1518_v57 = vld [vmem:[#allocation2 + $0x120] sm:$0xff] }
 0x15d   :  { %570 = vmatmul.bf16.gmra.mxu2 %v489_v12  ;;  %v1521_v12 = vld [vmem:[#allocation2 + $0x138] sm:$0xff]  ;;  %v456_v15 = vmax.f32 %v405_v10, 0.0 }
 0x15e   :  { %v372_v14 = vpop.f32.mrf.mxu1  ;;  %960 = vmatpush.bf16.msrb.mxu0 %v1521_v12 }
 0x15f   :  { %v373_v18 = vadd.f32 %v1735_v32, %v372_v14  ;;  %v455_v14 = vmax.f32 %v403_v9, 0.0 }
 0x161   :  { %v443_v24 = vmax.f32 %v373_v18, 0.0 }
 0x163   :  { %v409_v7 = vpop.f32.mrf.mxu3 }
 0x164   :  { %v410_v26 = vadd.f32 %v1735_v32, %v409_v7 }
 0x166   :  { %v374_v21 = vpop.f32.mrf.mxu1  ;;  %v458_v29 = vmax.f32 %v410_v26, 0.0 }
 0x167   :  { %v375_v22 = vadd.f32 %v1735_v32, %v374_v21  ;;  %v496_v21 = vpack.c.bf16 %v456_v15, %v455_v14 }
 0x169   :  { %v444_v25 = vmax.f32 %v375_v22, 0.0 }
 0x16b   :  { %v490_v27 = vpack.c.bf16 %v444_v25, %v443_v24  ;;  %v412_v13 = vpop.f32.mrf.mxu3  ;;  %v408_v25 = vadd.f32 %v1735_v32, %v407_v1 }
 0x16d   :  { %575 = vmatmul.bf16.gmra.mxu2 %v490_v27  ;;  %v1520_v27 = vld [vmem:[#allocation2 + $0x130] sm:$0xff] }
 0x16e   :  { %v377_v28 = vpop.f32.mrf.mxu1  ;;  %961 = vmatpush.bf16.msrb.mxu0 %v1520_v27 }
 0x16f   :  { %v378_v30 = vadd.f32 %v1735_v32, %v377_v28  ;;  %v457_v28 = vmax.f32 %v408_v25, 0.0 }
 0x171   :  { %v445_v34 = vmax.f32 %v378_v30, 0.0 }
 0x173   :  { %v414_v24 = vpop.f32.mrf.mxu3 }
 0x176   :  { %v379_v31 = vpop.f32.mrf.mxu1 }
 0x177   :  { %v380_v33 = vadd.f32 %v1735_v32, %v379_v31 }
 0x179   :  { %v446_v54 = vmax.f32 %v380_v33, 0.0 }
 0x17b   :  { %v491_v35 = vpack.c.bf16 %v446_v54, %v445_v34  ;;  %v417_v34 = vpop.f32.mrf.mxu3 }
 0x17c   :  { %v418_v55 = vadd.f32 %v1735_v32, %v417_v34 }
 0x17d   :  { %580 = vmatmul.bf16.gmra.mxu2 %v491_v35 }
 0x17e   :  { %v382_v36 = vpop.f32.mrf.mxu1 }
 0x17f   :  { %v383_v38 = vadd.f32 %v1735_v32, %v382_v36  ;;  %v497_v36 = vpack.c.bf16 %v458_v29, %v457_v28 }
 0x181   :  { %v447_v41 = vmax.f32 %v383_v38, 0.0 }
 0x186   :  { %v384_v39 = vpop.f32.mrf.mxu1 }
 0x187   :  { %v385_v40 = vadd.f32 %v1735_v32, %v384_v39  ;;  %v413_v39 = vadd.f32 %v1735_v32, %v412_v13 }
 0x189   :  { %v448_v42 = vmax.f32 %v385_v40, 0.0  ;;  %v415_v40 = vadd.f32 %v1735_v32, %v414_v24  ;;  %v459_v43 = vmax.f32 %v413_v39, 0.0 }
 0x18b   :  { %v492_v44 = vpack.c.bf16 %v448_v42, %v447_v41  ;;  %v1519_v41 = vld [vmem:[#allocation2 + $0x128] sm:$0xff]  ;;  %v419_v42 = vpop.f32.mrf.mxu3 }
 0x18c   :  { %962 = vmatpush.bf16.msrb.mxu0 %v1519_v41 }
 0x18d   :  { %585 = vmatmul.bf16.gmra.mxu2 %v492_v44  ;;  %v460_v44 = vmax.f32 %v415_v40, 0.0 }
 0x18e   :  { %v387_v46 = vpop.f32.mrf.mxu1 }
 0x18f   :  { %v388_v48 = vadd.f32 %v1735_v32, %v387_v46 }
 0x190   :  { %963 = vmatpush.bf16.msrb.mxu0 %v1518_v57 }
 0x191   :  { %v449_v51 = vmax.f32 %v388_v48, 0.0 }
 0x196   :  { %v389_v49 = vpop.f32.mrf.mxu1 }
 0x197   :  { %v390_v50 = vadd.f32 %v1735_v32, %v389_v49 }
 0x199   :  { %v450_v52 = vmax.f32 %v390_v50, 0.0  ;;  %v498_v50 = vpack.c.bf16 %v460_v44, %v459_v43 }
 0x19b   :  { %v493_v53 = vpack.c.bf16 %v450_v52, %v449_v51  ;;  %v422_v52 = vpop.f32.mrf.mxu3 }
 0x19d   :  { %590 = vmatmul.bf16.gmra.mxu2 %v493_v53 }
 0x19e   :  { %v392_v56 = vpop.f32.mrf.mxu1 }
 0x19f   :  { %v393_v58 = vadd.f32 %v1735_v32, %v392_v56  ;;  %v420_v56 = vadd.f32 %v1735_v32, %v419_v42 }
 0x1a1   :  { %v451_v62 = vmax.f32 %v393_v58, 0.0  ;;  %v461_v58 = vmax.f32 %v418_v55, 0.0 }
 0x1a3   :  { %v424_v61 = vpop.f32.mrf.mxu3 }
 0x1a4   :  { %v425_v7 = vadd.f32 %v1735_v32, %v424_v61 }
 0x1a6   :  { %v394_v59 = vpop.f32.mrf.mxu1  ;;  %v464_v10 = vmax.f32 %v425_v7, 0.0 }
 0x1a7   :  { %v395_v60 = vadd.f32 %v1735_v32, %v394_v59  ;;  %v462_v59 = vmax.f32 %v420_v56, 0.0 }
 0x1a9   :  { %v452_v63 = vmax.f32 %v395_v60, 0.0  ;;  %v499_v2 = vpack.c.bf16 %v462_v59, %v461_v58 }
 0x1ab   :  { %v494_v0 = vpack.c.bf16 %v452_v63, %v451_v62  ;;  %v427_v5 = vpop.f32.mrf.mxu3 }
 0x1ad   :  { %595 = vmatmul.bf16.gmra.mxu2 %v494_v0 }
 0x1bd   :  { %600 = vmatmul.bf16.gmra.mxu2 %v495_v6  ;;  %v423_v6 = vadd.f32 %v1735_v32, %v422_v52 }
 0x1bf   :  { %v463_v9 = vmax.f32 %v423_v6, 0.0 }
 0x1c0   :  { %v561_v8 = vpop.f32.mrf.mxu2 }
 0x1c1   :  { %v562_v16 = vadd.f32 %v1768_v11, %v561_v8  ;;  %v1517_v8 = vld [vmem:[#allocation2 + $0x118] sm:$0xff] }
 0x1c2   :  { %964 = vmatpush.bf16.msrb.mxu0 %v1517_v8 }
 0x1c3   :  { %v641_v19 = vmax.f32 %v562_v16, 0.0 }
 0x1c8   :  { %v563_v17 = vpop.f32.mrf.mxu2 }
 0x1c9   :  { %v564_v18 = vadd.f32 %v1768_v11, %v563_v17  ;;  %v500_v17 = vpack.c.bf16 %v464_v10, %v463_v9 }
 0x1cb   :  { %v642_v20 = vmax.f32 %v564_v18, 0.0  ;;  %v429_v18 = vpop.f32.mrf.mxu3 }
 0x1cd   :  { %605 = vmatmul.bf16.gmra.mxu2 %v496_v21  ;;  %v691_v22 = vpack.c.bf16 %v642_v20, %v641_v19  ;;  %v428_v21 = vadd.f32 %v1735_v32, %v427_v5 }
 0x1cf   :  { %764 = vmatmul.bf16.vlgmr.msrb.gmra.mxu3 %v691_v22  ;;  %v430_v22 = vadd.f32 %v1735_v32, %v429_v18  ;;  %v465_v25 = vmax.f32 %v428_v21, 0.0 }
 0x1d0   :  { %v566_v23 = vpop.f32.mrf.mxu2 }
 0x1d1   :  { %v567_v30 = vadd.f32 %v1768_v11, %v566_v23  ;;  %v1516_v23 = vld [vmem:[#allocation2 + $0x110] sm:$0xff]  ;;  %v466_v26 = vmax.f32 %v430_v22, 0.0 }
 0x1d2   :  { %965 = vmatpush.bf16.msrb.mxu0 %v1516_v23 }
 0x1d3   :  { %v643_v54 = vmax.f32 %v567_v30, 0.0  ;;  %v432_v24 = vpop.f32.mrf.mxu3 }
 0x1d8   :  { %v568_v31 = vpop.f32.mrf.mxu2 }
 0x1d9   :  { %v569_v33 = vadd.f32 %v1768_v11, %v568_v31 }
 0x1db   :  { %v644_v35 = vmax.f32 %v569_v33, 0.0  ;;  %v501_v33 = vpack.c.bf16 %v466_v26, %v465_v25 }
 0x1dd   :  { %610 = vmatmul.bf16.gmra.mxu2 %v497_v36  ;;  %v692_v37 = vpack.c.bf16 %v644_v35, %v643_v54  ;;  %v434_v54 = vpop.f32.mrf.mxu3  ;;  %v433_v36 = vadd.f32 %v1735_v32, %v432_v24 }
 0x1df   :  { %769 = vmatmul.bf16.gmra.mxu3 %v692_v37  ;;  %v435_v37 = vadd.f32 %v1735_v32, %v434_v54  ;;  %v467_v39 = vmax.f32 %v433_v36, 0.0 }
 0x1e0   :  { %v571_v38 = vpop.f32.mrf.mxu2 }
 0x1e1   :  { %v572_v45 = vadd.f32 %v1768_v11, %v571_v38  ;;  %v1515_v38 = vld [vmem:[#allocation2 + $0x108] sm:$0xff]  ;;  %v468_v40 = vmax.f32 %v435_v37, 0.0 }
 0x1e2   :  { %966 = vmatpush.bf16.msrb.mxu0 %v1515_v38 }
 0x1e3   :  { %v645_v48 = vmax.f32 %v572_v45, 0.0 }
 0x1e8   :  { %v573_v46 = vpop.f32.mrf.mxu2 }
 0x1e9   :  { %v574_v47 = vadd.f32 %v1768_v11, %v573_v46  ;;  %v502_v46 = vpack.c.bf16 %v468_v40, %v467_v39 }
 0x1eb   :  { %v646_v49 = vmax.f32 %v574_v47, 0.0 }
 0x1ed   :  { %615 = vmatmul.bf16.gmra.mxu2 %v498_v50  ;;  %v693_v51 = vpack.c.bf16 %v646_v49, %v645_v48  ;;  %v1514_v49 = vld [vmem:[#allocation2 + $0x100] sm:$0xff] }
 0x1ee   :  { %967 = vmatpush.bf16.msrb.mxu0 %v1514_v49 }
 0x1ef   :  { %774 = vmatmul.bf16.gmra.mxu3 %v693_v51 }
 0x1f0   :  { %v576_v53 = vpop.f32.mrf.mxu2 }
 0x1f1   :  { %v577_v60 = vadd.f32 %v1768_v11, %v576_v53 }
 0x1f3   :  { %v647_v0 = vmax.f32 %v577_v60, 0.0 }
 0x1f8   :  { %v578_v62 = vpop.f32.mrf.mxu2 }
 0x1f9   :  { %v579_v63 = vadd.f32 %v1768_v11, %v578_v62 }
 0x1fb   :  { %v648_v1 = vmax.f32 %v579_v63, 0.0  ;;  %v1529_v63 = vld [vmem:[#allocation2 + $0x178] sm:$0xff] }
 0x1fc   :  { %1164 = vmatpush.bf16.msrb.mxu1 %v1529_v63 }
 0x1fd   :  { %620 = vmatmul.bf16.gmra.mxu2 %v499_v2  ;;  %v694_v3 = vpack.c.bf16 %v648_v1, %v647_v0  ;;  %v1803_v2 = vld [vmem:[%s2023_s2 + $0x3] ss:$0 sm:$0xff] }
 0x1ff   :  { %779 = vmatmul.bf16.gmra.mxu3 %v694_v3 }
 0x200   :  { %v581_v4 = vpop.f32.mrf.mxu2 }
 0x201   :  { %v582_v12 = vadd.f32 %v1768_v11, %v581_v4 }
 0x203   :  { %v649_v15 = vmax.f32 %v582_v12, 0.0 }
 0x208   :  { %v583_v13 = vpop.f32.mrf.mxu2 }
 0x209   :  { %v584_v14 = vadd.f32 %v1768_v11, %v583_v13 }
 0x20b   :  { %v650_v16 = vmax.f32 %v584_v14, 0.0 }
 0x20d   :  { %v695_v19 = vpack.c.bf16 %v650_v16, %v649_v15  ;;  %625 = vmatmul.bf16.gmra.mxu2 %v500_v17  ;;  %v1528_v15 = vld [vmem:[#allocation2 + $0x170] sm:$0xff] }
 0x20e   :  { %1165 = vmatpush.bf16.msrb.mxu1 %v1528_v15 }
 0x20f   :  { %784 = vmatmul.bf16.gmra.mxu3 %v695_v19 }
 0x210   :  { %v586_v20 = vpop.f32.mrf.mxu2 }
 0x211   :  { %v587_v27 = vadd.f32 %v1768_v11, %v586_v20 }
 0x213   :  { %v651_v30 = vmax.f32 %v587_v27, 0.0 }
 0x218   :  { %v588_v28 = vpop.f32.mrf.mxu2 }
 0x219   :  { %v589_v29 = vadd.f32 %v1768_v11, %v588_v28 }
 0x21b   :  { %v652_v31 = vmax.f32 %v589_v29, 0.0 }
 0x21d   :  { %v696_v34 = vpack.c.bf16 %v652_v31, %v651_v30  ;;  %630 = vmatmul.bf16.gmra.mxu2 %v501_v33  ;;  %v1527_v30 = vld [vmem:[#allocation2 + $0x168] sm:$0xff] }
 0x21e   :  { %1166 = vmatpush.bf16.msrb.mxu1 %v1527_v30 }
 0x21f   :  { %789 = vmatmul.bf16.gmra.mxu3 %v696_v34 }
 0x220   :  { %v591_v35 = vpop.f32.mrf.mxu2 }
 0x221   :  { %v592_v41 = vadd.f32 %v1768_v11, %v591_v35 }
 0x223   :  { %v653_v44 = vmax.f32 %v592_v41, 0.0 }
 0x228   :  { %v593_v42 = vpop.f32.mrf.mxu2 }
 0x229   :  { %v594_v43 = vadd.f32 %v1768_v11, %v593_v42 }
 0x22b   :  { %v654_v45 = vmax.f32 %v594_v43, 0.0 }
 0x22d   :  { %v697_v47 = vpack.c.bf16 %v654_v45, %v653_v44  ;;  %635 = vmatmul.bf16.gmra.mxu2 %v502_v46  ;;  %v1526_v46 = vld [vmem:[#allocation2 + $0x160] sm:$0xff] }
 0x22e   :  { %1167 = vmatpush.bf16.msrb.mxu1 %v1526_v46 }
 0x22f   :  { %794 = vmatmul.bf16.gmra.mxu3 %v697_v47 }
 0x230   :  { %v596_v48 = vpop.f32.mrf.mxu2 }
 0x231   :  { %v597_v32 = vadd.f32 %v1768_v11, %v596_v48 }
 0x233   :  { %v655_v52 = vmax.f32 %v597_v32, 0.0 }
 0x238   :  { %v598_v50 = vpop.f32.mrf.mxu2 }
 0x239   :  { %v599_v51 = vadd.f32 %v1768_v11, %v598_v50 }
 0x23b   :  { %v656_v53 = vmax.f32 %v599_v51, 0.0 }
 0x23d   :  { %v698_v55 = vpack.c.bf16 %v656_v53, %v655_v52 }
 0x23f   :  { %799 = vmatmul.bf16.gmra.mxu3 %v698_v55 }
 0x240   :  { %v601_v56 = vpop.f32.mrf.mxu2 }
 0x241   :  { %v602_v57 = vadd.f32 %v1768_v11, %v601_v56 }
 0x243   :  { %v657_v60 = vmax.f32 %v602_v57, 0.0 }
 0x248   :  { %v603_v58 = vpop.f32.mrf.mxu2 }
 0x249   :  { %v604_v59 = vadd.f32 %v1768_v11, %v603_v58 }
 0x24b   :  { %v658_v61 = vmax.f32 %v604_v59, 0.0 }
 0x24d   :  { %v699_v62 = vpack.c.bf16 %v658_v61, %v657_v60  ;;  %v1525_v61 = vld [vmem:[#allocation2 + $0x158] sm:$0xff] }
 0x24e   :  { %1168 = vmatpush.bf16.msrb.mxu1 %v1525_v61 }
 0x24f   :  { %804 = vmatmul.bf16.gmra.mxu3 %v699_v62 }
 0x250   :  { %v606_v0 = vpop.f32.mrf.mxu2 }
 0x251   :  { %v607_v3 = vadd.f32 %v1768_v11, %v606_v0 }
 0x252   :  { %v765_v1 = vpop.f32.mrf.mxu3 }
 0x253   :  { %v766_v5 = vadd.f32 %v1803_v2, %v765_v1  ;;  %v659_v8 = vmax.f32 %v607_v3, 0.0 }
 0x255   :  { %v845_v12 = vmax.f32 %v766_v5, 0.0 }
 0x258   :  { %v608_v4 = vpop.f32.mrf.mxu2 }
 0x259   :  { %v609_v6 = vadd.f32 %v1768_v11, %v608_v4 }
 0x25a   :  { %v767_v7 = vpop.f32.mrf.mxu3 }
 0x25b   :  { %v660_v9 = vmax.f32 %v609_v6, 0.0  ;;  %v768_v10 = vadd.f32 %v1803_v2, %v767_v7 }
 0x25d   :  { %v700_v13 = vpack.c.bf16 %v660_v9, %v659_v8  ;;  %v846_v14 = vmax.f32 %v768_v10, 0.0 }
 0x25f   :  { %809 = vmatmul.bf16.gmra.mxu3 %v700_v13  ;;  %v895_v16 = vpack.c.bf16 %v846_v14, %v845_v12  ;;  %v1524_v14 = vld [vmem:[#allocation2 + $0x150] sm:$0xff] }
 0x260   :  { %v611_v17 = vpop.f32.mrf.mxu2  ;;  %1169 = vmatpush.bf16.msrb.mxu1 %v1524_v14 }
 0x261   :  { %968 = vmatmul.bf16.vlgmr.msrb.gmra.mxu0 %v895_v16  ;;  %v612_v19 = vadd.f32 %v1768_v11, %v611_v17 }
 0x262   :  { %v770_v18 = vpop.f32.mrf.mxu3 }
 0x263   :  { %v771_v21 = vadd.f32 %v1803_v2, %v770_v18  ;;  %v661_v24 = vmax.f32 %v612_v19, 0.0 }
 0x265   :  { %v847_v27 = vmax.f32 %v771_v21, 0.0 }
 0x268   :  { %v613_v20 = vpop.f32.mrf.mxu2 }
 0x269   :  { %v614_v22 = vadd.f32 %v1768_v11, %v613_v20 }
 0x26a   :  { %v772_v23 = vpop.f32.mrf.mxu3 }
 0x26b   :  { %v662_v25 = vmax.f32 %v614_v22, 0.0  ;;  %v773_v26 = vadd.f32 %v1803_v2, %v772_v23 }
 0x26d   :  { %v701_v28 = vpack.c.bf16 %v662_v25, %v661_v24  ;;  %v848_v29 = vmax.f32 %v773_v26, 0.0 }
 0x26f   :  { %814 = vmatmul.bf16.gmra.mxu3 %v701_v28  ;;  %v896_v31 = vpack.c.bf16 %v848_v29, %v847_v27  ;;  %v1523_v29 = vld [vmem:[#allocation2 + $0x148] sm:$0xff] }
 0x270   :  { %v616_v33 = vpop.f32.mrf.mxu2  ;;  %1170 = vmatpush.bf16.msrb.mxu1 %v1523_v29 }
 0x271   :  { %973 = vmatmul.bf16.gmra.mxu0 %v896_v31  ;;  %v617_v54 = vadd.f32 %v1768_v11, %v616_v33 }
 0x272   :  { %v775_v34 = vpop.f32.mrf.mxu3 }
 0x273   :  { %v776_v36 = vadd.f32 %v1803_v2, %v775_v34  ;;  %v663_v39 = vmax.f32 %v617_v54, 0.0 }
 0x275   :  { %v849_v42 = vmax.f32 %v776_v36, 0.0 }
 0x278   :  { %v618_v35 = vpop.f32.mrf.mxu2 }
 0x279   :  { %v619_v37 = vadd.f32 %v1768_v11, %v618_v35 }
 0x27a   :  { %v777_v38 = vpop.f32.mrf.mxu3 }
 0x27b   :  { %v664_v40 = vmax.f32 %v619_v37, 0.0  ;;  %v778_v41 = vadd.f32 %v1803_v2, %v777_v38 }
 0x27d   :  { %v702_v43 = vpack.c.bf16 %v664_v40, %v663_v39  ;;  %v850_v44 = vmax.f32 %v778_v41, 0.0 }
 0x27f   :  { %819 = vmatmul.bf16.gmra.mxu3 %v702_v43  ;;  %v897_v45 = vpack.c.bf16 %v850_v44, %v849_v42  ;;  %v1522_v44 = vld [vmem:[#allocation2 + $0x140] sm:$0xff] }
 0x280   :  { %v621_v47 = vpop.f32.mrf.mxu2  ;;  %1171 = vmatpush.bf16.msrb.mxu1 %v1522_v44 }
 0x281   :  { %978 = vmatmul.bf16.gmra.mxu0 %v897_v45  ;;  %v622_v49 = vadd.f32 %v1768_v11, %v621_v47 }
 0x282   :  { %v780_v48 = vpop.f32.mrf.mxu3 }
 0x283   :  { %v781_v50 = vadd.f32 %v1803_v2, %v780_v48  ;;  %v665_v53 = vmax.f32 %v622_v49, 0.0 }
 0x285   :  { %v851_v57 = vmax.f32 %v781_v50, 0.0 }
 0x288   :  { %v623_v32 = vpop.f32.mrf.mxu2 }
 0x289   :  { %v624_v51 = vadd.f32 %v1768_v11, %v623_v32 }
 0x28a   :  { %v782_v52 = vpop.f32.mrf.mxu3 }
 0x28b   :  { %v666_v55 = vmax.f32 %v624_v51, 0.0  ;;  %v783_v56 = vadd.f32 %v1803_v2, %v782_v52 }
 0x28d   :  { %v703_v58 = vpack.c.bf16 %v666_v55, %v665_v53  ;;  %v852_v59 = vmax.f32 %v783_v56, 0.0 }
 0x28f   :  { %824 = vmatmul.bf16.gmra.mxu3 %v703_v58  ;;  %v898_v60 = vpack.c.bf16 %v852_v59, %v851_v57  ;;  %v1840_v59 = vld [vmem:[%s2023_s2 + $0x4] ss:$0 sm:$0xff] }
 0x290   :  { %v626_v62 = vpop.f32.mrf.mxu2 }
 0x291   :  { %983 = vmatmul.bf16.gmra.mxu0 %v898_v60  ;;  %v627_v0 = vadd.f32 %v1768_v11, %v626_v62 }
 0x292   :  { %v785_v63 = vpop.f32.mrf.mxu3 }
 0x293   :  { %v786_v3 = vadd.f32 %v1803_v2, %v785_v63  ;;  %v667_v6 = vmax.f32 %v627_v0, 0.0 }
 0x295   :  { %v853_v9 = vmax.f32 %v786_v3, 0.0 }
 0x298   :  { %v628_v1 = vpop.f32.mrf.mxu2 }
 0x299   :  { %v629_v4 = vadd.f32 %v1768_v11, %v628_v1 }
 0x29a   :  { %v787_v5 = vpop.f32.mrf.mxu3 }
 0x29b   :  { %v668_v7 = vmax.f32 %v629_v4, 0.0  ;;  %v788_v8 = vadd.f32 %v1803_v2, %v787_v5 }
 0x29d   :  { %v704_v10 = vpack.c.bf16 %v668_v7, %v667_v6  ;;  %v854_v12 = vmax.f32 %v788_v8, 0.0 }
 0x29f   :  { %v899_v13 = vpack.c.bf16 %v854_v12, %v853_v9  ;;  %829 = vmatmul.bf16.gmra.mxu3 %v704_v10 }
 0x2a0   :  { %v631_v15 = vpop.f32.mrf.mxu2 }
 0x2a1   :  { %988 = vmatmul.bf16.gmra.mxu0 %v899_v13  ;;  %v632_v17 = vadd.f32 %v1768_v11, %v631_v15 }
 0x2a2   :  { %v790_v16 = vpop.f32.mrf.mxu3 }
 0x2a3   :  { %v791_v19 = vadd.f32 %v1803_v2, %v790_v16  ;;  %v669_v22 = vmax.f32 %v632_v17, 0.0 }
 0x2a5   :  { %v855_v25 = vmax.f32 %v791_v19, 0.0 }
 0x2a8   :  { %v633_v18 = vpop.f32.mrf.mxu2 }
 0x2a9   :  { %v634_v20 = vadd.f32 %v1768_v11, %v633_v18 }
 0x2aa   :  { %v792_v21 = vpop.f32.mrf.mxu3 }
 0x2ab   :  { %v670_v23 = vmax.f32 %v634_v20, 0.0  ;;  %v793_v24 = vadd.f32 %v1803_v2, %v792_v21 }
 0x2ad   :  { %v705_v26 = vpack.c.bf16 %v670_v23, %v669_v22  ;;  %v856_v27 = vmax.f32 %v793_v24, 0.0 }
 0x2af   :  { %v900_v28 = vpack.c.bf16 %v856_v27, %v855_v25  ;;  %834 = vmatmul.bf16.gmra.mxu3 %v705_v26 }
 0x2b0   :  { %v636_v30 = vpop.f32.mrf.mxu2 }
 0x2b1   :  { %993 = vmatmul.bf16.gmra.mxu0 %v900_v28  ;;  %v637_v33 = vadd.f32 %v1768_v11, %v636_v30 }
 0x2b2   :  { %v795_v31 = vpop.f32.mrf.mxu3 }
 0x2b3   :  { %v796_v54 = vadd.f32 %v1803_v2, %v795_v31  ;;  %v671_v37 = vmax.f32 %v637_v33, 0.0 }
 0x2b5   :  { %v857_v40 = vmax.f32 %v796_v54, 0.0 }
 0x2b8   :  { %v638_v34 = vpop.f32.mrf.mxu2 }
 0x2b9   :  { %v639_v35 = vadd.f32 %v1768_v11, %v638_v34 }
 0x2ba   :  { %v797_v36 = vpop.f32.mrf.mxu3 }
 0x2bb   :  { %v672_v38 = vmax.f32 %v639_v35, 0.0  ;;  %v798_v39 = vadd.f32 %v1803_v2, %v797_v36 }
 0x2bd   :  { %v706_v41 = vpack.c.bf16 %v672_v38, %v671_v37  ;;  %v858_v42 = vmax.f32 %v798_v39, 0.0 }
 0x2bf   :  { %v901_v43 = vpack.c.bf16 %v858_v42, %v857_v40  ;;  %839 = vmatmul.bf16.gmra.mxu3 %v706_v41 }
 0x2c1   :  { %998 = vmatmul.bf16.gmra.mxu0 %v901_v43 }
 0x2c2   :  { %v800_v45 = vpop.f32.mrf.mxu3 }
 0x2c3   :  { %v801_v46 = vadd.f32 %v1803_v2, %v800_v45 }
 0x2c5   :  { %v859_v11 = vmax.f32 %v801_v46, 0.0 }
 0x2ca   :  { %v802_v47 = vpop.f32.mrf.mxu3 }
 0x2cb   :  { %v803_v48 = vadd.f32 %v1803_v2, %v802_v47 }
 0x2cd   :  { %v860_v49 = vmax.f32 %v803_v48, 0.0 }
 0x2cf   :  { %v902_v32 = vpack.c.bf16 %v860_v49, %v859_v11 }
 0x2d1   :  { %1003 = vmatmul.bf16.gmra.mxu0 %v902_v32 }
 0x2d2   :  { %v805_v50 = vpop.f32.mrf.mxu3 }
 0x2d3   :  { %v806_v51 = vadd.f32 %v1803_v2, %v805_v50 }
 0x2d5   :  { %v861_v55 = vmax.f32 %v806_v51, 0.0 }
 0x2da   :  { %v807_v52 = vpop.f32.mrf.mxu3 }
 0x2db   :  { %v808_v53 = vadd.f32 %v1803_v2, %v807_v52 }
 0x2dd   :  { %v862_v56 = vmax.f32 %v808_v53, 0.0 }
 0x2de   :  { %v969_v57 = vpop.f32.mrf.mxu0 }
 0x2df   :  { %v903_v58 = vpack.c.bf16 %v862_v56, %v861_v55  ;;  %v970_v61 = vadd.f32 %v1840_v59, %v969_v57 }
 0x2e1   :  { %1008 = vmatmul.bf16.gmra.mxu0 %v903_v58  ;;  %v1049_v0 = vmax.f32 %v970_v61, 0.0 }
 0x2e2   :  { %v810_v60 = vpop.f32.mrf.mxu3 }
 0x2e3   :  { %v811_v1 = vadd.f32 %v1803_v2, %v810_v60 }
 0x2e5   :  { %v863_v7 = vmax.f32 %v811_v1, 0.0 }
 0x2e6   :  { %v971_v62 = vpop.f32.mrf.mxu0 }
 0x2e7   :  { %v972_v63 = vadd.f32 %v1840_v59, %v971_v62 }
 0x2e9   :  { %v1050_v3 = vmax.f32 %v972_v63, 0.0 }
 0x2ea   :  { %v812_v4 = vpop.f32.mrf.mxu3 }
 0x2eb   :  { %v813_v5 = vadd.f32 %v1803_v2, %v812_v4  ;;  %v1099_v6 = vpack.c.bf16 %v1050_v3, %v1049_v0 }
 0x2ed   :  { %v864_v8 = vmax.f32 %v813_v5, 0.0  ;;  %1172 = vmatmul.bf16.vlgmr.msrb.gmra.mxu1 %v1099_v6 }
 0x2ee   :  { %v974_v9 = vpop.f32.mrf.mxu0 }
 0x2ef   :  { %v904_v10 = vpack.c.bf16 %v864_v8, %v863_v7  ;;  %v975_v13 = vadd.f32 %v1840_v59, %v974_v9 }
 0x2f1   :  { %1013 = vmatmul.bf16.gmra.mxu0 %v904_v10  ;;  %v1051_v16 = vmax.f32 %v975_v13, 0.0 }
 0x2f2   :  { %v815_v12 = vpop.f32.mrf.mxu3 }
 0x2f3   :  { %v816_v17 = vadd.f32 %v1803_v2, %v815_v12 }
 0x2f5   :  { %v865_v22 = vmax.f32 %v816_v17, 0.0 }
 0x2f6   :  { %v976_v14 = vpop.f32.mrf.mxu0 }
 0x2f7   :  { %v977_v15 = vadd.f32 %v1840_v59, %v976_v14 }
 0x2f9   :  { %v1052_v18 = vmax.f32 %v977_v15, 0.0 }
 0x2fa   :  { %v817_v19 = vpop.f32.mrf.mxu3 }
 0x2fb   :  { %v818_v20 = vadd.f32 %v1803_v2, %v817_v19  ;;  %v1100_v21 = vpack.c.bf16 %v1052_v18, %v1051_v16 }
 0x2fd   :  { %v866_v23 = vmax.f32 %v818_v20, 0.0  ;;  %1177 = vmatmul.bf16.gmra.mxu1 %v1100_v21 }
 0x2fe   :  { %v979_v24 = vpop.f32.mrf.mxu0 }
 0x2ff   :  { %v905_v25 = vpack.c.bf16 %v866_v23, %v865_v22  ;;  %v980_v27 = vadd.f32 %v1840_v59, %v979_v24 }
 0x301   :  { %1018 = vmatmul.bf16.gmra.mxu0 %v905_v25  ;;  %v1053_v30 = vmax.f32 %v980_v27, 0.0 }
 0x302   :  { %v820_v26 = vpop.f32.mrf.mxu3 }
 0x303   :  { %v821_v31 = vadd.f32 %v1803_v2, %v820_v26 }
 0x305   :  { %v867_v36 = vmax.f32 %v821_v31, 0.0 }
 0x306   :  { %v981_v28 = vpop.f32.mrf.mxu0 }
 0x307   :  { %v982_v29 = vadd.f32 %v1840_v59, %v981_v28 }
 0x309   :  { %v1054_v33 = vmax.f32 %v982_v29, 0.0 }
 0x30a   :  { %v822_v34 = vpop.f32.mrf.mxu3 }
 0x30b   :  { %v823_v54 = vadd.f32 %v1803_v2, %v822_v34  ;;  %v1101_v35 = vpack.c.bf16 %v1054_v33, %v1053_v30 }
 0x30d   :  { %v868_v37 = vmax.f32 %v823_v54, 0.0  ;;  %1182 = vmatmul.bf16.gmra.mxu1 %v1101_v35 }
 0x30e   :  { %v984_v38 = vpop.f32.mrf.mxu0 }
 0x30f   :  { %v906_v39 = vpack.c.bf16 %v868_v37, %v867_v36  ;;  %v985_v41 = vadd.f32 %v1840_v59, %v984_v38 }
 0x311   :  { %1023 = vmatmul.bf16.gmra.mxu0 %v906_v39  ;;  %v1055_v44 = vmax.f32 %v985_v41, 0.0 }
 0x312   :  { %v825_v40 = vpop.f32.mrf.mxu3 }
 0x313   :  { %v826_v45 = vadd.f32 %v1803_v2, %v825_v40 }
 0x315   :  { %v869_v49 = vmax.f32 %v826_v45, 0.0 }
 0x316   :  { %v986_v42 = vpop.f32.mrf.mxu0 }
 0x317   :  { %v987_v43 = vadd.f32 %v1840_v59, %v986_v42 }
 0x319   :  { %v1056_v46 = vmax.f32 %v987_v43, 0.0  ;;  %v1877_v43 = vld [vmem:[%s2023_s2 + $0x5] ss:$0 sm:$0xff] }
 0x31a   :  { %v827_v47 = vpop.f32.mrf.mxu3 }
 0x31b   :  { %v828_v48 = vadd.f32 %v1803_v2, %v827_v47  ;;  %v1102_v11 = vpack.c.bf16 %v1056_v46, %v1055_v44 }
 0x31d   :  { %v870_v32 = vmax.f32 %v828_v48, 0.0  ;;  %1187 = vmatmul.bf16.gmra.mxu1 %v1102_v11 }
 0x31e   :  { %v989_v50 = vpop.f32.mrf.mxu0 }
 0x31f   :  { %v907_v51 = vpack.c.bf16 %v870_v32, %v869_v49  ;;  %v990_v53 = vadd.f32 %v1840_v59, %v989_v50 }
 0x321   :  { %1028 = vmatmul.bf16.gmra.mxu0 %v907_v51  ;;  %v1057_v57 = vmax.f32 %v990_v53, 0.0 }
 0x322   :  { %v830_v52 = vpop.f32.mrf.mxu3 }
 0x323   :  { %v831_v58 = vadd.f32 %v1803_v2, %v830_v52 }
 0x325   :  { %v871_v0 = vmax.f32 %v831_v58, 0.0 }
 0x326   :  { %v991_v55 = vpop.f32.mrf.mxu0 }
 0x327   :  { %v992_v56 = vadd.f32 %v1840_v59, %v991_v55 }
 0x329   :  { %v1058_v60 = vmax.f32 %v992_v56, 0.0 }
 0x32a   :  { %v832_v61 = vpop.f32.mrf.mxu3 }
 0x32b   :  { %v1103_v62 = vpack.c.bf16 %v1058_v60, %v1057_v57  ;;  %v833_v63 = vadd.f32 %v1803_v2, %v832_v61 }
 0x32d   :  { %v872_v1 = vmax.f32 %v833_v63, 0.0  ;;  %1192 = vmatmul.bf16.gmra.mxu1 %v1103_v62 }
 0x32e   :  { %v994_v3 = vpop.f32.mrf.mxu0 }
 0x32f   :  { %v908_v4 = vpack.c.bf16 %v872_v1, %v871_v0  ;;  %v995_v6 = vadd.f32 %v1840_v59, %v994_v3 }
 0x331   :  { %1033 = vmatmul.bf16.gmra.mxu0 %v908_v4  ;;  %v1059_v9 = vmax.f32 %v995_v6, 0.0 }
 0x332   :  { %v835_v5 = vpop.f32.mrf.mxu3 }
 0x333   :  { %v836_v10 = vadd.f32 %v1803_v2, %v835_v5 }
 0x335   :  { %v873_v16 = vmax.f32 %v836_v10, 0.0 }
 0x336   :  { %v996_v7 = vpop.f32.mrf.mxu0 }
 0x337   :  { %v997_v8 = vadd.f32 %v1840_v59, %v996_v7 }
 0x339   :  { %v1060_v12 = vmax.f32 %v997_v8, 0.0 }
 0x33a   :  { %v837_v13 = vpop.f32.mrf.mxu3 }
 0x33b   :  { %v1104_v14 = vpack.c.bf16 %v1060_v12, %v1059_v9  ;;  %v838_v15 = vadd.f32 %v1803_v2, %v837_v13 }
 0x33d   :  { %v874_v17 = vmax.f32 %v838_v15, 0.0  ;;  %1197 = vmatmul.bf16.gmra.mxu1 %v1104_v14 }
 0x33e   :  { %v999_v18 = vpop.f32.mrf.mxu0 }
 0x33f   :  { %v909_v19 = vpack.c.bf16 %v874_v17, %v873_v16  ;;  %v1000_v21 = vadd.f32 %v1840_v59, %v999_v18 }
 0x341   :  { %1038 = vmatmul.bf16.gmra.mxu0 %v909_v19  ;;  %v1061_v24 = vmax.f32 %v1000_v21, 0.0 }
 0x342   :  { %v840_v20 = vpop.f32.mrf.mxu3 }
 0x343   :  { %v841_v25 = vadd.f32 %v1803_v2, %v840_v20 }
 0x345   :  { %v875_v30 = vmax.f32 %v841_v25, 0.0 }
 0x346   :  { %v1001_v22 = vpop.f32.mrf.mxu0 }
 0x347   :  { %v1002_v23 = vadd.f32 %v1840_v59, %v1001_v22 }
 0x349   :  { %v1062_v26 = vmax.f32 %v1002_v23, 0.0 }
 0x34a   :  { %v842_v27 = vpop.f32.mrf.mxu3 }
 0x34b   :  { %v1105_v28 = vpack.c.bf16 %v1062_v26, %v1061_v24  ;;  %v843_v29 = vadd.f32 %v1803_v2, %v842_v27 }
 0x34d   :  { %v876_v31 = vmax.f32 %v843_v29, 0.0  ;;  %1202 = vmatmul.bf16.gmra.mxu1 %v1105_v28 }
 0x34e   :  { %v1004_v33 = vpop.f32.mrf.mxu0 }
 0x34f   :  { %v910_v34 = vpack.c.bf16 %v876_v31, %v875_v30  ;;  %v1005_v54 = vadd.f32 %v1840_v59, %v1004_v33 }
 0x351   :  { %1043 = vmatmul.bf16.gmra.mxu0 %v910_v34  ;;  %v1063_v37 = vmax.f32 %v1005_v54, 0.0 }
 0x356   :  { %v1006_v35 = vpop.f32.mrf.mxu0 }
 0x357   :  { %v1007_v36 = vadd.f32 %v1840_v59, %v1006_v35 }
 0x359   :  { %v1064_v38 = vmax.f32 %v1007_v36, 0.0 }
 0x35b   :  { %v1106_v39 = vpack.c.bf16 %v1064_v38, %v1063_v37 }
 0x35d   :  { %1207 = vmatmul.bf16.gmra.mxu1 %v1106_v39 }
 0x35e   :  { %v1009_v40 = vpop.f32.mrf.mxu0 }
 0x35f   :  { %v1010_v41 = vadd.f32 %v1840_v59, %v1009_v40 }
 0x361   :  { %v1065_v44 = vmax.f32 %v1010_v41, 0.0 }
 0x366   :  { %v1011_v42 = vpop.f32.mrf.mxu0 }
 0x367   :  { %v1012_v2 = vadd.f32 %v1840_v59, %v1011_v42 }
 0x369   :  { %v1066_v45 = vmax.f32 %v1012_v2, 0.0 }
 0x36a   :  { %v1173_v46 = vpop.f32.mrf.mxu1 }
 0x36b   :  { %v1107_v47 = vpack.c.bf16 %v1066_v45, %v1065_v44  ;;  %v1174_v48 = vadd.f32 %v1877_v43, %v1173_v46 }
 0x36d   :  { %1253 = vst [vmem:[%s2024_s3] sm:$0xff] %v1174_v48  ;;  %1212 = vmatmul.bf16.gmra.mxu1 %v1107_v47 }
 0x36e   :  { %v1014_v11 = vpop.f32.mrf.mxu0 }
 0x36f   :  { %v1015_v50 = vadd.f32 %v1840_v59, %v1014_v11 }
 0x371   :  { %v1067_v53 = vmax.f32 %v1015_v50, 0.0 }
 0x372   :  { %v1175_v49 = vpop.f32.mrf.mxu1 }
 0x373   :  { %v1176_v32 = vadd.f32 %v1877_v43, %v1175_v49 }
 0x375   :  { %1254 = vst [vmem:[%s2024_s3 + $0x8] sm:$0xff] %v1176_v32 }
 0x376   :  { %v1016_v51 = vpop.f32.mrf.mxu0 }
 0x377   :  { %v1017_v52 = vadd.f32 %v1840_v59, %v1016_v51 }
 0x379   :  { %v1068_v55 = vmax.f32 %v1017_v52, 0.0 }
 0x37a   :  { %v1178_v56 = vpop.f32.mrf.mxu1 }
 0x37b   :  { %v1108_v57 = vpack.c.bf16 %v1068_v55, %v1067_v53  ;;  %v1179_v58 = vadd.f32 %v1877_v43, %v1178_v56 }
 0x37d   :  { %1255 = vst [vmem:[%s2024_s3 + $0x10] sm:$0xff] %v1179_v58  ;;  %1217 = vmatmul.bf16.gmra.mxu1 %v1108_v57 }
 0x37e   :  { %v1019_v60 = vpop.f32.mrf.mxu0 }
 0x37f   :  { %v1020_v63 = vadd.f32 %v1840_v59, %v1019_v60 }
 0x381   :  { %v1069_v3 = vmax.f32 %v1020_v63, 0.0 }
 0x382   :  { %v1180_v61 = vpop.f32.mrf.mxu1 }
 0x383   :  { %v1181_v62 = vadd.f32 %v1877_v43, %v1180_v61 }
 0x385   :  { %1256 = vst [vmem:[%s2024_s3 + $0x18] sm:$0xff] %v1181_v62 }
 0x386   :  { %v1021_v0 = vpop.f32.mrf.mxu0 }
 0x387   :  { %v1022_v1 = vadd.f32 %v1840_v59, %v1021_v0 }
 0x389   :  { %v1070_v4 = vmax.f32 %v1022_v1, 0.0 }
 0x38a   :  { %v1183_v5 = vpop.f32.mrf.mxu1 }
 0x38b   :  { %v1109_v6 = vpack.c.bf16 %v1070_v4, %v1069_v3  ;;  %v1184_v7 = vadd.f32 %v1877_v43, %v1183_v5 }
 0x38d   :  { %1257 = vst [vmem:[%s2024_s3 + $0x20] sm:$0xff] %v1184_v7  ;;  %1222 = vmatmul.bf16.gmra.mxu1 %v1109_v6 }
 0x38e   :  { %v1024_v8 = vpop.f32.mrf.mxu0 }
 0x38f   :  { %v1025_v12 = vadd.f32 %v1840_v59, %v1024_v8 }
 0x391   :  { %v1071_v15 = vmax.f32 %v1025_v12, 0.0 }
 0x392   :  { %v1185_v9 = vpop.f32.mrf.mxu1 }
 0x393   :  { %v1186_v10 = vadd.f32 %v1877_v43, %v1185_v9 }
 0x395   :  { %1258 = vst [vmem:[%s2024_s3 + $0x28] sm:$0xff] %v1186_v10 }
 0x396   :  { %v1026_v13 = vpop.f32.mrf.mxu0 }
 0x397   :  { %v1027_v14 = vadd.f32 %v1840_v59, %v1026_v13 }
 0x399   :  { %v1072_v16 = vmax.f32 %v1027_v14, 0.0 }
 0x39a   :  { %v1188_v17 = vpop.f32.mrf.mxu1 }
 0x39b   :  { %v1110_v18 = vpack.c.bf16 %v1072_v16, %v1071_v15  ;;  %v1189_v19 = vadd.f32 %v1877_v43, %v1188_v17 }
 0x39d   :  { %1259 = vst [vmem:[%s2024_s3 + $0x30] sm:$0xff] %v1189_v19  ;;  %1227 = vmatmul.bf16.gmra.mxu1 %v1110_v18 }
 0x39e   :  { %v1029_v20 = vpop.f32.mrf.mxu0 }
 0x39f   :  { %v1030_v23 = vadd.f32 %v1840_v59, %v1029_v20 }
 0x3a1   :  { %v1073_v26 = vmax.f32 %v1030_v23, 0.0 }
 0x3a2   :  { %v1190_v21 = vpop.f32.mrf.mxu1 }
 0x3a3   :  { %v1191_v22 = vadd.f32 %v1877_v43, %v1190_v21 }
 0x3a5   :  { %1260 = vst [vmem:[%s2024_s3 + $0x38] sm:$0xff] %v1191_v22 }
 0x3a6   :  { %v1031_v24 = vpop.f32.mrf.mxu0 }
 0x3a7   :  { %v1032_v25 = vadd.f32 %v1840_v59, %v1031_v24 }
 0x3a9   :  { %v1074_v27 = vmax.f32 %v1032_v25, 0.0 }
 0x3aa   :  { %v1193_v28 = vpop.f32.mrf.mxu1 }
 0x3ab   :  { %v1111_v29 = vpack.c.bf16 %v1074_v27, %v1073_v26  ;;  %v1194_v30 = vadd.f32 %v1877_v43, %v1193_v28 }
 0x3ad   :  { %1261 = vst [vmem:[%s2024_s3 + $0x40] sm:$0xff] %v1194_v30  ;;  %1232 = vmatmul.bf16.gmra.mxu1 %v1111_v29 }
 0x3ae   :  { %v1034_v31 = vpop.f32.mrf.mxu0 }
 0x3af   :  { %v1035_v54 = vadd.f32 %v1840_v59, %v1034_v31 }
 0x3b1   :  { %v1075_v37 = vmax.f32 %v1035_v54, 0.0 }
 0x3b2   :  { %v1195_v33 = vpop.f32.mrf.mxu1 }
 0x3b3   :  { %v1196_v34 = vadd.f32 %v1877_v43, %v1195_v33 }
 0x3b5   :  { %1262 = vst [vmem:[%s2024_s3 + $0x48] sm:$0xff] %v1196_v34 }
 0x3b6   :  { %v1036_v35 = vpop.f32.mrf.mxu0 }
 0x3b7   :  { %v1037_v36 = vadd.f32 %v1840_v59, %v1036_v35 }
 0x3b9   :  { %v1076_v38 = vmax.f32 %v1037_v36, 0.0 }
 0x3ba   :  { %v1198_v39 = vpop.f32.mrf.mxu1 }
 0x3bb   :  { %v1112_v40 = vpack.c.bf16 %v1076_v38, %v1075_v37  ;;  %v1199_v41 = vadd.f32 %v1877_v43, %v1198_v39 }
 0x3bd   :  { %1263 = vst [vmem:[%s2024_s3 + $0x50] sm:$0xff] %v1199_v41  ;;  %1237 = vmatmul.bf16.gmra.mxu1 %v1112_v40 }
 0x3be   :  { %v1039_v42 = vpop.f32.mrf.mxu0 }
 0x3bf   :  { %v1040_v45 = vadd.f32 %v1840_v59, %v1039_v42 }
 0x3c1   :  { %v1077_v48 = vmax.f32 %v1040_v45, 0.0 }
 0x3c2   :  { %v1200_v2 = vpop.f32.mrf.mxu1 }
 0x3c3   :  { %v1201_v44 = vadd.f32 %v1877_v43, %v1200_v2 }
 0x3c5   :  { %1264 = vst [vmem:[%s2024_s3 + $0x58] sm:$0xff] %v1201_v44 }
 0x3c6   :  { %v1041_v46 = vpop.f32.mrf.mxu0 }
 0x3c7   :  { %v1042_v47 = vadd.f32 %v1840_v59, %v1041_v46 }
 0x3c9   :  { %v1078_v11 = vmax.f32 %v1042_v47, 0.0 }
 0x3ca   :  { %v1203_v49 = vpop.f32.mrf.mxu1 }
 0x3cb   :  { %v1113_v32 = vpack.c.bf16 %v1078_v11, %v1077_v48  ;;  %v1204_v50 = vadd.f32 %v1877_v43, %v1203_v49 }
 0x3cd   :  { %1265 = vst [vmem:[%s2024_s3 + $0x60] sm:$0xff] %v1204_v50  ;;  %1242 = vmatmul.bf16.gmra.mxu1 %v1113_v32 }
 0x3ce   :  { %v1044_v51 = vpop.f32.mrf.mxu0 }
 0x3cf   :  { %v1045_v55 = vadd.f32 %v1840_v59, %v1044_v51 }
 0x3d1   :  { %v1079_v58 = vmax.f32 %v1045_v55, 0.0 }
 0x3d2   :  { %v1205_v52 = vpop.f32.mrf.mxu1 }
 0x3d3   :  { %v1206_v53 = vadd.f32 %v1877_v43, %v1205_v52 }
 0x3d5   :  { %1266 = vst [vmem:[%s2024_s3 + $0x68] sm:$0xff] %v1206_v53 }
 0x3d6   :  { %v1046_v56 = vpop.f32.mrf.mxu0 }
 0x3d7   :  { %v1047_v57 = vadd.f32 %v1840_v59, %v1046_v56 }
 0x3d9   :  { %v1080_v60 = vmax.f32 %v1047_v57, 0.0 }
 0x3da   :  { %v1208_v61 = vpop.f32.mrf.mxu1 }
 0x3db   :  { %v1114_v62 = vpack.c.bf16 %v1080_v60, %v1079_v58  ;;  %v1209_v63 = vadd.f32 %v1877_v43, %v1208_v61 }
 0x3dd   :  { %1267 = vst [vmem:[%s2024_s3 + $0x70] sm:$0xff] %v1209_v63  ;;  %1247 = vmatmul.bf16.gmra.mxu1 %v1114_v62 }
 0x3e2   :  { %v1210_v0 = vpop.f32.mrf.mxu1 }
 0x3e3   :  { %v1211_v1 = vadd.f32 %v1877_v43, %v1210_v0 }
 0x3e5   :  { %1268 = vst [vmem:[%s2024_s3 + $0x78] sm:$0xff] %v1211_v1 }
 0x3ea   :  { %v1213_v3 = vpop.f32.mrf.mxu1 }
 0x3eb   :  { %v1214_v59 = vadd.f32 %v1877_v43, %v1213_v3 }
 0x3ed   :  { %1269 = vst [vmem:[%s2024_s3 + $0x80] sm:$0xff] %v1214_v59 }
 0x3f2   :  { %v1215_v4 = vpop.f32.mrf.mxu1 }
 0x3f3   :  { %v1216_v5 = vadd.f32 %v1877_v43, %v1215_v4 }
 0x3f5   :  { %1270 = vst [vmem:[%s2024_s3 + $0x88] sm:$0xff] %v1216_v5 }
 0x3fa   :  { %v1218_v6 = vpop.f32.mrf.mxu1 }
 0x3fb   :  { %v1219_v7 = vadd.f32 %v1877_v43, %v1218_v6 }
 0x3fd   :  { %1271 = vst [vmem:[%s2024_s3 + $0x90] sm:$0xff] %v1219_v7 }
 0x402   :  { %v1220_v8 = vpop.f32.mrf.mxu1 }
 0x403   :  { %v1221_v9 = vadd.f32 %v1877_v43, %v1220_v8 }
 0x405   :  { %1272 = vst [vmem:[%s2024_s3 + $0x98] sm:$0xff] %v1221_v9 }
 0x40a   :  { %v1223_v10 = vpop.f32.mrf.mxu1 }
 0x40b   :  { %v1224_v12 = vadd.f32 %v1877_v43, %v1223_v10 }
 0x40d   :  { %1273 = vst [vmem:[%s2024_s3 + $0xa0] sm:$0xff] %v1224_v12 }
 0x412   :  { %v1225_v13 = vpop.f32.mrf.mxu1 }
 0x413   :  { %v1226_v14 = vadd.f32 %v1877_v43, %v1225_v13 }
 0x415   :  { %1274 = vst [vmem:[%s2024_s3 + $0xa8] sm:$0xff] %v1226_v14 }
 0x41a   :  { %v1228_v15 = vpop.f32.mrf.mxu1 }
 0x41b   :  { %v1229_v16 = vadd.f32 %v1877_v43, %v1228_v15 }
 0x41d   :  { %1275 = vst [vmem:[%s2024_s3 + $0xb0] sm:$0xff] %v1229_v16 }
 0x422   :  { %v1230_v17 = vpop.f32.mrf.mxu1 }
 0x423   :  { %v1231_v18 = vadd.f32 %v1877_v43, %v1230_v17 }
 0x425   :  { %1276 = vst [vmem:[%s2024_s3 + $0xb8] sm:$0xff] %v1231_v18 }
 0x42a   :  { %v1233_v19 = vpop.f32.mrf.mxu1 }
 0x42b   :  { %v1234_v20 = vadd.f32 %v1877_v43, %v1233_v19 }
 0x42d   :  { %1277 = vst [vmem:[%s2024_s3 + $0xc0] sm:$0xff] %v1234_v20 }
 0x432   :  { %v1235_v21 = vpop.f32.mrf.mxu1 }
 0x433   :  { %v1236_v22 = vadd.f32 %v1877_v43, %v1235_v21 }
 0x435   :  { %1278 = vst [vmem:[%s2024_s3 + $0xc8] sm:$0xff] %v1236_v22 }
 0x43a   :  { %v1238_v23 = vpop.f32.mrf.mxu1 }
 0x43b   :  { %v1239_v24 = vadd.f32 %v1877_v43, %v1238_v23 }
 0x43d   :  { %1279 = vst [vmem:[%s2024_s3 + $0xd0] sm:$0xff] %v1239_v24 }
 0x442   :  { %v1240_v25 = vpop.f32.mrf.mxu1 }
 0x443   :  { %v1241_v26 = vadd.f32 %v1877_v43, %v1240_v25 }
 0x445   :  { %1280 = vst [vmem:[%s2024_s3 + $0xd8] sm:$0xff] %v1241_v26 }
 0x44a   :  { %v1243_v27 = vpop.f32.mrf.mxu1 }
 0x44b   :  { %v1244_v28 = vadd.f32 %v1877_v43, %v1243_v27 }
 0x44d   :  { %1281 = vst [vmem:[%s2024_s3 + $0xe0] sm:$0xff] %v1244_v28 }
 0x452   :  { %v1245_v29 = vpop.f32.mrf.mxu1 }
 0x453   :  { %v1246_v30 = vadd.f32 %v1877_v43, %v1245_v29 }
 0x455   :  { %1282 = vst [vmem:[%s2024_s3 + $0xe8] sm:$0xff] %v1246_v30 }
 0x45a   :  { %v1248_v31 = vpop.f32.mrf.mxu1 }
 0x45b   :  { %v1249_v33 = vadd.f32 %v1877_v43, %v1248_v31 }
 0x45d   :  { %1283 = vst [vmem:[%s2024_s3 + $0xf0] sm:$0xff] %v1249_v33 }
 0x462   :  { %v1250_v34 = vpop.f32.mrf.mxu1 }
 0x463   :  { %v1251_v54 = vadd.f32 %v1877_v43, %v1250_v34 }
 0x465   :  { %1284 = vst [vmem:[%s2024_s3 + $0xf8] sm:$0xff] %v1251_v54 }
 0x466   :  { %1289 = vsyncpa [#allocation3], 1 }

</bundles_post_ra>
